<compile_context>
chip_gen: v5e
topology: v5e:2x2
jax: 0.10.0
libtpu: 0.0.40
codegen_flags: <defaults>
</compile_context>

<pallas_src>
import functools
import math

import jax
import jax.numpy as jnp
from jax.experimental import pallas as pl
from jax.experimental.pallas import tpu as pltpu


def _supcon_kernel(fq_ref, fk_ref, lq_ref, lk_ref, out_ref,
                   l_sc, psum_sc, cnt_sc, *,
                   inv_temp, n_valid, has_pad, loss_scale, epsilon):
    qi = pl.program_id(0)
    ki = pl.program_id(1)
    tq = fq_ref.shape[0]
    tk = fk_ref.shape[0]
    qlo = qi * tq
    klo = ki * tk

    # ---- init running stats at the first key block -------------------------
    @pl.when(ki == 0)
    def _():
        l_sc[...] = jnp.zeros(l_sc.shape, jnp.float32)
        psum_sc[...] = jnp.zeros(psum_sc.shape, jnp.float32)
        cnt_sc[...] = jnp.zeros(cnt_sc.shape, jnp.float32)

    # ---- s_ij = <f_i, f_j> / T (1/T pre-folded into fq; NT-form matmul) ----
    s = jax.lax.dot_general(fq_ref[...], fk_ref[...], (((1,), (1,)), ((), ())),
                            preferred_element_type=jnp.float32)   # [Tq, Tk]

    # Constant max shift: normalized features => s <= 1/T (the diagonal).
    # With bf16 operands s_ii may round slightly above 1/T -> exp barely > 1.
    ex = jnp.exp(s - inv_temp)
    posf = jnp.where(lq_ref[...] == lk_ref[...], 1.0, 0.0)   # same-label mask
    ps = posf * s

    # Only blocks touching the diagonal and/or padded key columns need masks.
    is_diag = jnp.logical_and(qlo < klo + tk, klo < qlo + tq)
    if has_pad:
        is_edge = jnp.logical_or(is_diag, klo + tk > n_valid)
    else:
        is_edge = is_diag

    @pl.when(jnp.logical_not(is_edge))
    def _fast():
        l_sc[...] += jnp.sum(ex, axis=1, keepdims=True)
        psum_sc[...] += jnp.sum(ps, axis=1, keepdims=True)
        cnt_sc[...] += jnp.sum(posf, axis=1, keepdims=True)

    @pl.when(is_edge)
    def _slow():
        row_g = qlo + jax.lax.broadcasted_iota(jnp.int32, (tq, tk), 0)
        col_g = klo + jax.lax.broadcasted_iota(jnp.int32, (tq, tk), 1)
        keep = row_g != col_g                 # logits_mask: exclude diagonal
        if has_pad:
            keep = jnp.logical_and(keep, col_g < n_valid)   # drop padded cols
        l_sc[...] += jnp.sum(jnp.where(keep, ex, 0.0), axis=1, keepdims=True)
        psum_sc[...] += jnp.sum(jnp.where(keep, ps, 0.0), axis=1, keepdims=True)
        cnt_sc[...] += jnp.sum(jnp.where(keep, posf, 0.0), axis=1, keepdims=True)

    # ---- finalize: per-row loss contribution --------------------------------
    @pl.when(ki == pl.num_programs(1) - 1)
    def _():
        cnt = cnt_sc[...]
        # log_prob_ij = s_ij - [1/T + log(sum_{j!=i} exp(s_ij - 1/T) + eps)]
        log_denom = inv_temp + jnp.log(l_sc[...] + epsilon)
        mean_log_prob_pos = (psum_sc[...] - cnt * log_denom) / (cnt + epsilon)
        out_ref[...] = -loss_scale * mean_log_prob_pos


def _round_up(x, m):
    return ((x + m - 1) // m) * m


def supcon_loss(features, labels=None, *, temperature=0.07,
                base_temperature=0.07, epsilon=1e-7,
                block_q=None, block_k=None, use_bf16_matmul=True):
    """Supervised contrastive loss. features: [N, D], labels: [N] or None."""
    if features.ndim != 2:
        raise ValueError('`features` needs to be [n_samples, feature_dim]')
    n, d = features.shape
    if labels is None:
        # labels == arange(n) => label-equality mask == eye(n), matching the
        # torch.eye(batch_size) branch of the reference (loss == 0).
        labels = jnp.arange(n, dtype=jnp.int32)
    labels = jnp.asarray(labels).reshape(-1).astype(jnp.int32)
    if labels.shape[0] != n:
        raise ValueError('Num of labels does not match num of features')

    # Tile heuristic: keep >= 2 query blocks for moderate N so both v7x
    # TensorCores get work on the "parallel" q axis; wider key tiles once N
    # is large enough (lane-dense reductions, fewer grid steps).
    if block_q is None:
        block_q = 256 if n > 512 else 128
    if block_k is None:
        block_k = 256 if n > 256 else 128
    assert block_q % 8 == 0 and block_k % 128 == 0

    npad = _round_up(n, math.lcm(block_q, block_k))
    dpad = _round_up(d, 128)
    inv_temp = 1.0 / float(temperature)

    # One-time O(N*D) normalization in the wrapper (x / max(||x||, 1e-12)),
    # 1/T folded into the query operand; bf16 operands by default (MXU-native,
    # half the streamed key bytes; accumulation stays f32 in the kernel).
    f32 = jnp.asarray(features, jnp.float32)
    norm = jnp.sqrt(jnp.sum(f32 * f32, axis=1, keepdims=True))
    f_norm = f32 / jnp.maximum(norm, 1e-12)
    feat_dtype = jnp.bfloat16 if use_bf16_matmul else jnp.float32
    q_feat = (f_norm * inv_temp).astype(feat_dtype)
    k_feat = f_norm.astype(feat_dtype)

    q_pad = jnp.pad(q_feat, ((0, npad - n), (0, dpad - d)))
    k_pad = jnp.pad(k_feat, ((0, npad - n), (0, dpad - d)))
    l_pad = jnp.pad(labels, (0, npad - n), constant_values=-1)
    lab_row = l_pad.reshape(npad, 1)     # pre-shaped: no in-kernel transpose
    lab_col = l_pad.reshape(1, npad)

    grid = (npad // block_q, npad // block_k)

    kernel = functools.partial(
        _supcon_kernel,
        inv_temp=inv_temp,
        n_valid=int(n),
        has_pad=bool(npad != n),
        loss_scale=float(temperature / base_temperature),
        epsilon=float(epsilon),
    )

    # VMEM: double-buffered feature blocks + a few (Tq,Tk) f32 temporaries,
    # 2x headroom, capped at 48 MiB (headroom under v7x's 64 MiB physical).
    feat_bytes = 2 if use_bf16_matmul else 4
    est = (feat_bytes * 2 * (block_q + block_k) * dpad
           + 4 * 6 * block_q * block_k
           + 4 * (8 * block_q + 2 * block_k))
    vmem_limit = int(min(max(2 * est, 16 * 1024 * 1024), 48 * 1024 * 1024))

    per_row = pl.pallas_call(
        kernel,
        out_shape=jax.ShapeDtypeStruct((npad, 1), jnp.float32),
        grid=grid,
        in_specs=[
            pl.BlockSpec((block_q, dpad), lambda qi, ki: (qi, 0)),  # query rows
            pl.BlockSpec((block_k, dpad), lambda qi, ki: (ki, 0)),  # key rows
            pl.BlockSpec((block_q, 1), lambda qi, ki: (qi, 0)),     # labels (N,1)
            pl.BlockSpec((1, block_k), lambda qi, ki: (0, ki)),     # labels (1,N)
        ],
        out_specs=pl.BlockSpec((block_q, 1), lambda qi, ki: (qi, 0)),
        scratch_shapes=[pltpu.VMEM((block_q, 1), jnp.float32)] * 3,
        compiler_params=pltpu.CompilerParams(
            dimension_semantics=("parallel", "arbitrary"),
            vmem_limit_bytes=vmem_limit),
    )(q_pad, k_pad, lab_row, lab_col)

    # Final O(N) mean over the real (unpadded) rows.
    return jnp.mean(per_row[:n, 0])


def _supcon_ref(features, labels, temperature=0.07, base_temperature=0.07,
                epsilon=1e-7):
    """Pure-JAX reference mirroring the PyTorch module (forward)."""
    n = features.shape[0]
    if labels is None:
        mask = jnp.eye(n, dtype=jnp.float32)
    else:
        lab = jnp.asarray(labels).reshape(-1, 1)
        mask = (lab == lab.T).astype(jnp.float32)
    norm = jnp.sqrt(jnp.sum(features * features, axis=1, keepdims=True))
    f = features / jnp.maximum(norm, 1e-12)
    sim = f @ f.T
    logits = sim - jnp.max(sim, axis=1, keepdims=True)
    logits_mask = 1.0 - jnp.eye(n, dtype=jnp.float32)
    mask = mask * logits_mask
    exp_logits = jnp.exp(logits / temperature) * logits_mask
    log_prob = logits / temperature - jnp.log(
        exp_logits.sum(1, keepdims=True) + epsilon)
    mlpp = (mask * log_prob).sum(1) / (mask.sum(1) + epsilon)
    return jnp.mean(-(temperature / base_temperature) * mlpp)


if __name__ == "__main__":
    key = jax.random.PRNGKey(0)
    k1, k2, k3, k4 = jax.random.split(key, 4)

    # Small single-tile case: N=16, D=48 (padded to 128 x 128, grid (1, 1)).
    n1, d1 = 16, 48
    feats1 = jax.random.normal(k1, (n1, d1), dtype=jnp.float32)
    labs1 = jax.random.randint(k2, (n1,), 0, 4, dtype=jnp.int32)
    ref1 = _supcon_ref(feats1, labs1)

    # f32-operand path: tight check of the kernel math.
    loss1_f32 = supcon_loss(feats1, labs1, use_bf16_matmul=False)
    jax.block_until_ready(loss1_f32)
    assert jnp.isfinite(loss1_f32)
    assert jnp.allclose(loss1_f32, ref1, atol=1e-3, rtol=1e-3), (loss1_f32, ref1)

    # Default bf16-MXU path: looser tolerance (bf16 operand rounding * 1/T).
    loss1_bf16 = supcon_loss(feats1, labs1)
    jax.block_until_ready(loss1_bf16)
    assert jnp.isfinite(loss1_bf16)
    assert jnp.allclose(loss1_bf16, ref1, atol=7e-2, rtol=7e-2), (loss1_bf16, ref1)

    # labels=None branch (identity mask -> zero positives -> zero loss).
    loss_eye = supcon_loss(feats1, None)
    jax.block_until_ready(loss_eye)
    assert jnp.allclose(loss_eye, _supcon_ref(feats1, None), atol=1e-6)

    # Multi-tile case: N=200, D=96 -> padded 256 x 128, grid (2, 2). Exercises
    # the fast path (block (1,0)), the diagonal slow path ((0,0),(1,1)) and
    # the padded-column slow path ((0,1),(1,1)) plus the key-block reduction.
    n2, d2 = 200, 96
    feats2 = jax.random.normal(k3, (n2, d2), dtype=jnp.float32)
    labs2 = jax.random.randint(k4, (n2,), 0, 7, dtype=jnp.int32)
    ref2 = _supcon_ref(feats2, labs2)

    loss2_f32 = supcon_loss(feats2, labs2, block_q=128, block_k=128,
                            use_bf16_matmul=False)
    jax.block_until_ready(loss2_f32)
    assert jnp.isfinite(loss2_f32)
    assert jnp.allclose(loss2_f32, ref2, atol=1e-3, rtol=1e-3), (loss2_f32, ref2)

    loss2_bf16 = supcon_loss(feats2, labs2, block_q=128, block_k=128)
    jax.block_until_ready(loss2_bf16)
    assert jnp.isfinite(loss2_bf16)
    assert jnp.allclose(loss2_bf16, ref2, atol=7e-2, rtol=7e-2), (loss2_bf16, ref2)

    print("KERNEL_OK")
</pallas_src>

<mosaic_0001>
module attributes {stable_mosaic.version = 11 : i64} {
  func.func @_supcon_kernel(%arg0: i32, %arg1: i32, %arg2: memref<128x128xf32, #tpu.memory_space<vmem>>, %arg3: memref<128x128xf32, #tpu.memory_space<vmem>>, %arg4: memref<128x1xi32, #tpu.memory_space<vmem>>, %arg5: memref<1x128xi32, #tpu.memory_space<vmem>>, %arg6: memref<128x1xf32, #tpu.memory_space<vmem>>, %arg7: memref<128x1xf32, #tpu.memory_space<vmem>>, %arg8: memref<128x1xf32, #tpu.memory_space<vmem>>, %arg9: memref<128x1xf32, #tpu.memory_space<vmem>>) attributes {dimension_semantics = [#tpu.dimension_semantics<parallel>, #tpu.dimension_semantics<arbitrary>], iteration_bounds = array<i64: 1, 1>, scalar_prefetch = 0 : i64, scratch_operands = 3 : i64, tpu.core_type = #tpu.core_type<tc>, window_params = [{transform_indices = @transform_0, window_bounds = array<i64: 128, 128>}, {transform_indices = @transform_1, window_bounds = array<i64: 128, 128>}, {transform_indices = @transform_2, window_bounds = array<i64: 128, 1>}, {transform_indices = @transform_3, window_bounds = array<i64: 1, 128>}, {transform_indices = @transform_4, window_bounds = array<i64: 128, 1>}]} {
    %c128_i32 = arith.constant 128 : i32
    %0 = arith.muli %arg0, %c128_i32 : i32
    %c128_i32_0 = arith.constant 128 : i32
    %1 = arith.muli %arg1, %c128_i32_0 : i32
    %c0_i32 = arith.constant 0 : i32
    %2 = arith.cmpi eq, %arg1, %c0_i32 : i32
    %3 = arith.extui %2 : i1 to i32
    %c0_i32_1 = arith.constant 0 : i32
    %4 = arith.cmpi ne, %3, %c0_i32_1 : i32
    scf.if %4 {
      %cst_19 = arith.constant 0.000000e+00 : f32
      %36 = vector.broadcast %cst_19 : f32 to vector<128x1xf32>
      %c0_20 = arith.constant 0 : index
      %c0_21 = arith.constant 0 : index
      %37 = vector.load %arg7[%c0_20, %c0_21] : memref<128x1xf32, #tpu.memory_space<vmem>>, vector<128x1xf32>
      tpu.vector_store %arg7[%c0_20, %c0_21], %36 {strides = array<i32>} : memref<128x1xf32, #tpu.memory_space<vmem>>, vector<128x1xf32>,
      %cst_22 = arith.constant 0.000000e+00 : f32
      %38 = vector.broadcast %cst_22 : f32 to vector<128x1xf32>
      %c0_23 = arith.constant 0 : index
      %c0_24 = arith.constant 0 : index
      %39 = vector.load %arg8[%c0_23, %c0_24] : memref<128x1xf32, #tpu.memory_space<vmem>>, vector<128x1xf32>
      tpu.vector_store %arg8[%c0_23, %c0_24], %38 {strides = array<i32>} : memref<128x1xf32, #tpu.memory_space<vmem>>, vector<128x1xf32>,
      %cst_25 = arith.constant 0.000000e+00 : f32
      %40 = vector.broadcast %cst_25 : f32 to vector<128x1xf32>
      %c0_26 = arith.constant 0 : index
      %c0_27 = arith.constant 0 : index
      %41 = vector.load %arg9[%c0_26, %c0_27] : memref<128x1xf32, #tpu.memory_space<vmem>>, vector<128x1xf32>
      tpu.vector_store %arg9[%c0_26, %c0_27], %40 {strides = array<i32>} : memref<128x1xf32, #tpu.memory_space<vmem>>, vector<128x1xf32>,
    } else {
    }
    %c0 = arith.constant 0 : index
    %c0_2 = arith.constant 0 : index
    %5 = vector.load %arg2[%c0, %c0_2] : memref<128x128xf32, #tpu.memory_space<vmem>>, vector<128x128xf32>
    %c0_3 = arith.constant 0 : index
    %c0_4 = arith.constant 0 : index
    %6 = vector.load %arg3[%c0_3, %c0_4] : memref<128x128xf32, #tpu.memory_space<vmem>>, vector<128x128xf32>
    %cst = arith.constant dense<0.000000e+00> : vector<128x128xf32>
    %7 = tpu.matmul %5, %6, %cst {dimension_numbers = #tpu.dot_dimension_numbers<[1], [1], [0], [0], [0, 0, 1, 0], [], []>} : vector<128x128xf32>, vector<128x128xf32>, vector<128x128xf32> -> vector<128x128xf32>
    %cst_5 = arith.constant 14.2857141 : f32
    %8 = vector.broadcast %cst_5 : f32 to vector<128x128xf32>
    %9 = arith.subf %7, %8 : vector<128x128xf32>
    %10 = math.exp %9 : vector<128x128xf32>
    %c0_6 = arith.constant 0 : index
    %c0_7 = arith.constant 0 : index
    %11 = vector.load %arg4[%c0_6, %c0_7] : memref<128x1xi32, #tpu.memory_space<vmem>>, vector<128x1xi32>
    %c0_8 = arith.constant 0 : index
    %c0_9 = arith.constant 0 : index
    %12 = vector.load %arg5[%c0_8, %c0_9] : memref<1x128xi32, #tpu.memory_space<vmem>>, vector<1x128xi32>
    %13 = vector.broadcast %11 : vector<128x1xi32> to vector<128x128xi32>
    %14 = vector.broadcast %12 : vector<1x128xi32> to vector<128x128xi32>
    %15 = arith.cmpi eq, %13, %14 : vector<128x128xi32>
    %cst_10 = arith.constant 1.000000e+00 : f32
    %cst_11 = arith.constant 0.000000e+00 : f32
    %16 = vector.broadcast %cst_10 : f32 to vector<128x128xf32>
    %17 = vector.broadcast %cst_11 : f32 to vector<128x128xf32>
    %18 = arith.select %15, %16, %17 : vector<128x128xi1>, vector<128x128xf32>
    %19 = arith.mulf %18, %7 : vector<128x128xf32>
    %c128_i32_12 = arith.constant 128 : i32
    %20 = arith.addi %1, %c128_i32_12 : i32
    %21 = arith.cmpi slt, %0, %20 : i32
    %c128_i32_13 = arith.constant 128 : i32
    %22 = arith.addi %0, %c128_i32_13 : i32
    %23 = arith.cmpi slt, %1, %22 : i32
    %24 = arith.andi %21, %23 : i1
    %c128_i32_14 = arith.constant 128 : i32
    %25 = arith.addi %1, %c128_i32_14 : i32
    %c16_i32 = arith.constant 16 : i32
    %26 = arith.cmpi sgt, %25, %c16_i32 : i32
    %27 = arith.ori %24, %26 : i1
    %true = arith.constant true
    %28 = arith.xori %27, %true : i1
    %29 = arith.extui %28 : i1 to i32
    %c0_i32_15 = arith.constant 0 : i32
    %30 = arith.cmpi ne, %29, %c0_i32_15 : i32
    scf.if %30 {
      %c0_19 = arith.constant 0 : index
      %c0_20 = arith.constant 0 : index
      %36 = vector.load %arg7[%c0_19, %c0_20] : memref<128x1xf32, #tpu.memory_space<vmem>>, vector<128x1xf32>
      %cst_21 = arith.constant dense<0.000000e+00> : vector<128xf32>
      %37 = vector.multi_reduction <add>, %10, %cst_21 [1] : vector<128x128xf32> to vector<128xf32>
      %38 = vector.shape_cast %37 : vector<128xf32> to vector<128x1xf32>
      %39 = arith.addf %36, %38 : vector<128x1xf32>
      %c0_22 = arith.constant 0 : index
      %c0_23 = arith.constant 0 : index
      %40 = vector.load %arg7[%c0_22, %c0_23] : memref<128x1xf32, #tpu.memory_space<vmem>>, vector<128x1xf32>
      tpu.vector_store %arg7[%c0_22, %c0_23], %39 {strides = array<i32>} : memref<128x1xf32, #tpu.memory_space<vmem>>, vector<128x1xf32>,
      %c0_24 = arith.constant 0 : index
      %c0_25 = arith.constant 0 : index
      %41 = vector.load %arg8[%c0_24, %c0_25] : memref<128x1xf32, #tpu.memory_space<vmem>>, vector<128x1xf32>
      %cst_26 = arith.constant dense<0.000000e+00> : vector<128xf32>
      %42 = vector.multi_reduction <add>, %19, %cst_26 [1] : vector<128x128xf32> to vector<128xf32>
      %43 = vector.shape_cast %42 : vector<128xf32> to vector<128x1xf32>
      %44 = arith.addf %41, %43 : vector<128x1xf32>
      %c0_27 = arith.constant 0 : index
      %c0_28 = arith.constant 0 : index
      %45 = vector.load %arg8[%c0_27, %c0_28] : memref<128x1xf32, #tpu.memory_space<vmem>>, vector<128x1xf32>
      tpu.vector_store %arg8[%c0_27, %c0_28], %44 {strides = array<i32>} : memref<128x1xf32, #tpu.memory_space<vmem>>, vector<128x1xf32>,
      %c0_29 = arith.constant 0 : index
      %c0_30 = arith.constant 0 : index
      %46 = vector.load %arg9[%c0_29, %c0_30] : memref<128x1xf32, #tpu.memory_space<vmem>>, vector<128x1xf32>
      %cst_31 = arith.constant dense<0.000000e+00> : vector<128xf32>
      %47 = vector.multi_reduction <add>, %18, %cst_31 [1] : vector<128x128xf32> to vector<128xf32>
      %48 = vector.shape_cast %47 : vector<128xf32> to vector<128x1xf32>
      %49 = arith.addf %46, %48 : vector<128x1xf32>
      %c0_32 = arith.constant 0 : index
      %c0_33 = arith.constant 0 : index
      %50 = vector.load %arg9[%c0_32, %c0_33] : memref<128x1xf32, #tpu.memory_space<vmem>>, vector<128x1xf32>
      tpu.vector_store %arg9[%c0_32, %c0_33], %49 {strides = array<i32>} : memref<128x1xf32, #tpu.memory_space<vmem>>, vector<128x1xf32>,
    } else {
    }
    %31 = arith.extui %27 : i1 to i32
    %c0_i32_16 = arith.constant 0 : i32
    %32 = arith.cmpi ne, %31, %c0_i32_16 : i32
    scf.if %32 {
      %36 = tpu.iota {dimensions = array<i32: 0>} : vector<128x128xi32>
      %37 = vector.broadcast %0 : i32 to vector<128x128xi32>
      %38 = arith.addi %37, %36 : vector<128x128xi32>
      %39 = tpu.iota {dimensions = array<i32: 1>} : vector<128x128xi32>
      %40 = vector.broadcast %1 : i32 to vector<128x128xi32>
      %41 = arith.addi %40, %39 : vector<128x128xi32>
      %42 = arith.cmpi ne, %38, %41 : vector<128x128xi32>
      %c16_i32_19 = arith.constant 16 : i32
      %43 = vector.broadcast %c16_i32_19 : i32 to vector<128x128xi32>
      %44 = arith.cmpi slt, %41, %43 : vector<128x128xi32>
      %45 = arith.andi %42, %44 : vector<128x128xi1>
      %c0_20 = arith.constant 0 : index
      %c0_21 = arith.constant 0 : index
      %46 = vector.load %arg7[%c0_20, %c0_21] : memref<128x1xf32, #tpu.memory_space<vmem>>, vector<128x1xf32>
      %cst_22 = arith.constant 0.000000e+00 : f32
      %47 = vector.broadcast %cst_22 : f32 to vector<128x128xf32>
      %48 = arith.select %45, %10, %47 : vector<128x128xi1>, vector<128x128xf32>
      %cst_23 = arith.constant dense<0.000000e+00> : vector<128xf32>
      %49 = vector.multi_reduction <add>, %48, %cst_23 [1] : vector<128x128xf32> to vector<128xf32>
      %50 = vector.shape_cast %49 : vector<128xf32> to vector<128x1xf32>
      %51 = arith.addf %46, %50 : vector<128x1xf32>
      %c0_24 = arith.constant 0 : index
      %c0_25 = arith.constant 0 : index
      %52 = vector.load %arg7[%c0_24, %c0_25] : memref<128x1xf32, #tpu.memory_space<vmem>>, vector<128x1xf32>
      tpu.vector_store %arg7[%c0_24, %c0_25], %51 {strides = array<i32>} : memref<128x1xf32, #tpu.memory_space<vmem>>, vector<128x1xf32>,
      %c0_26 = arith.constant 0 : index
      %c0_27 = arith.constant 0 : index
      %53 = vector.load %arg8[%c0_26, %c0_27] : memref<128x1xf32, #tpu.memory_space<vmem>>, vector<128x1xf32>
      %cst_28 = arith.constant 0.000000e+00 : f32
      %54 = vector.broadcast %cst_28 : f32 to vector<128x128xf32>
      %55 = arith.select %45, %19, %54 : vector<128x128xi1>, vector<128x128xf32>
      %cst_29 = arith.constant dense<0.000000e+00> : vector<128xf32>
      %56 = vector.multi_reduction <add>, %55, %cst_29 [1] : vector<128x128xf32> to vector<128xf32>
      %57 = vector.shape_cast %56 : vector<128xf32> to vector<128x1xf32>
      %58 = arith.addf %53, %57 : vector<128x1xf32>
      %c0_30 = arith.constant 0 : index
      %c0_31 = arith.constant 0 : index
      %59 = vector.load %arg8[%c0_30, %c0_31] : memref<128x1xf32, #tpu.memory_space<vmem>>, vector<128x1xf32>
      tpu.vector_store %arg8[%c0_30, %c0_31], %58 {strides = array<i32>} : memref<128x1xf32, #tpu.memory_space<vmem>>, vector<128x1xf32>,
      %c0_32 = arith.constant 0 : index
      %c0_33 = arith.constant 0 : index
      %60 = vector.load %arg9[%c0_32, %c0_33] : memref<128x1xf32, #tpu.memory_space<vmem>>, vector<128x1xf32>
      %cst_34 = arith.constant 0.000000e+00 : f32
      %61 = vector.broadcast %cst_34 : f32 to vector<128x128xf32>
      %62 = arith.select %45, %18, %61 : vector<128x128xi1>, vector<128x128xf32>
      %cst_35 = arith.constant dense<0.000000e+00> : vector<128xf32>
      %63 = vector.multi_reduction <add>, %62, %cst_35 [1] : vector<128x128xf32> to vector<128xf32>
      %64 = vector.shape_cast %63 : vector<128xf32> to vector<128x1xf32>
      %65 = arith.addf %60, %64 : vector<128x1xf32>
      %c0_36 = arith.constant 0 : index
      %c0_37 = arith.constant 0 : index
      %66 = vector.load %arg9[%c0_36, %c0_37] : memref<128x1xf32, #tpu.memory_space<vmem>>, vector<128x1xf32>
      tpu.vector_store %arg9[%c0_36, %c0_37], %65 {strides = array<i32>} : memref<128x1xf32, #tpu.memory_space<vmem>>, vector<128x1xf32>,
    } else {
    }
    %c0_i32_17 = arith.constant 0 : i32
    %33 = arith.cmpi eq, %arg1, %c0_i32_17 : i32
    %34 = arith.extui %33 : i1 to i32
    %c0_i32_18 = arith.constant 0 : i32
    %35 = arith.cmpi ne, %34, %c0_i32_18 : i32
    scf.if %35 {
      %c0_19 = arith.constant 0 : index
      %c0_20 = arith.constant 0 : index
      %36 = vector.load %arg9[%c0_19, %c0_20] : memref<128x1xf32, #tpu.memory_space<vmem>>, vector<128x1xf32>
      %c0_21 = arith.constant 0 : index
      %c0_22 = arith.constant 0 : index
      %37 = vector.load %arg7[%c0_21, %c0_22] : memref<128x1xf32, #tpu.memory_space<vmem>>, vector<128x1xf32>
      %cst_23 = arith.constant 1.000000e-07 : f32
      %38 = vector.broadcast %cst_23 : f32 to vector<128x1xf32>
      %39 = arith.addf %37, %38 : vector<128x1xf32>
      %40 = math.log %39 : vector<128x1xf32>
      %cst_24 = arith.constant 14.2857141 : f32
      %41 = vector.broadcast %cst_24 : f32 to vector<128x1xf32>
      %42 = arith.addf %41, %40 : vector<128x1xf32>
      %c0_25 = arith.constant 0 : index
      %c0_26 = arith.constant 0 : index
      %43 = vector.load %arg8[%c0_25, %c0_26] : memref<128x1xf32, #tpu.memory_space<vmem>>, vector<128x1xf32>
      %44 = arith.mulf %36, %42 : vector<128x1xf32>
      %45 = arith.subf %43, %44 : vector<128x1xf32>
      %cst_27 = arith.constant 1.000000e-07 : f32
      %46 = vector.broadcast %cst_27 : f32 to vector<128x1xf32>
      %47 = arith.addf %36, %46 : vector<128x1xf32>
      %48 = arith.divf %45, %47 : vector<128x1xf32>
      %cst_28 = arith.constant -1.000000e+00 : f32
      %49 = vector.broadcast %cst_28 : f32 to vector<128x1xf32>
      %50 = arith.mulf %49, %48 : vector<128x1xf32>
      %c0_29 = arith.constant 0 : index
      %c0_30 = arith.constant 0 : index
      %51 = vector.load %arg6[%c0_29, %c0_30] : memref<128x1xf32, #tpu.memory_space<vmem>>, vector<128x1xf32>
      tpu.vector_store %arg6[%c0_29, %c0_30], %50 {strides = array<i32>} : memref<128x1xf32, #tpu.memory_space<vmem>>, vector<128x1xf32>,
    } else {
    }
    return
  }
  func.func @transform_0(%arg0: i32, %arg1: i32) -> (i32, i32) {
    %c0_i32 = arith.constant 0 : i32
    %c0_i32_0 = arith.constant 0 : i32
    return %arg0, %c0_i32 : i32, i32
  }
  func.func @transform_1(%arg0: i32, %arg1: i32) -> (i32, i32) {
    %c0_i32 = arith.constant 0 : i32
    %c0_i32_0 = arith.constant 0 : i32
    return %arg1, %c0_i32 : i32, i32
  }
  func.func @transform_2(%arg0: i32, %arg1: i32) -> (i32, i32) {
    %c0_i32 = arith.constant 0 : i32
    %c0_i32_0 = arith.constant 0 : i32
    return %arg0, %c0_i32 : i32, i32
  }
  func.func @transform_3(%arg0: i32, %arg1: i32) -> (i32, i32) {
    %c0_i32 = arith.constant 0 : i32
    %c0_i32_0 = arith.constant 0 : i32
    return %c0_i32, %arg1 : i32, i32
  }
  func.func @transform_4(%arg0: i32, %arg1: i32) -> (i32, i32) {
    %c0_i32 = arith.constant 0 : i32
    %c0_i32_0 = arith.constant 0 : i32
    return %arg0, %c0_i32 : i32, i32
  }
}

</mosaic_0001>

<bundles_post_ra>
// kernel: tpu_custom_call.1
= control target key start
LH: loop header
LB: loop body
LE: loop exit
PB: predicated region body
PF: predicated region fallthrough
CT: control target
= control target key end

     0   :  { %9 = vsyncpa [#allocation6], 0  ;;  %s1600_s18 = smov [#allocation5]   ;;  %s1601_s20 = smov 128   ;;  %s2925_s0 = inlined_call_operand.vmem [shape: f32[128,128], index: 0, kind: input, shape index: {}]   ;;  %s2926_s1 = inlined_call_operand.hbm [shape: f32[128,128], index: 1, kind: input, shape index: {}]   ;;  %s2927_s2 = inlined_call_operand.vmem [shape: s32[128,1], index: 2, kind: input, shape index: {}]   ;;  %s2928_s3 = inlined_call_operand.vmem [shape: s32[1,128], index: 3, kind: input, shape index: {}]   ;;  %s2929_s4 = inlined_call_operand.vmem [shape: f32[128,1], index: 4, kind: output, shape index: {}]  }
   0x1   :  { %s16_s17 = sshll.u32 %s2926_s1, 4  ;;  %s18_s19 = sshll.u32 %s1600_s18, 4  ;;  %s17_s17 = int_to_ptr.hbm [resolvable:$true] %s16_s17  ;;  %s19_s19 = int_to_ptr.vmem [resolvable:$true] %s18_s19 }
   0x2   :  { %s1602_s21 = smov 8  }
   0x3   :  { %24 = dma.hbm_to_vmem [thread:$0]  %s17_s17, 2048, %s19_s19, [#allocation6], %s1601_s20, %s1601_s20, %s1602_s21  }
   0x4   :  { %1598 = dma.done.wait [#allocation6], 2048  }
   0x5   :  { %1599 = vsyncadd [#allocation6], 4294965248  ;;  %v1603_v0 = vmov 0   ;;  %v235_v1 = vld [vmem:[%s2927_s2 + $0x10] sm:$0xff]  ;;  %v233_v2 = vld [vmem:[%s2927_s2] sm:$0xff]  ;;  %v358_v50 = vlaneseq  ;;  %v2953_v56 = vmov 0 }
   0x6   :  { %1473 = vset.pattern.permute.xlu1 %v1603_v0  ;;  %1472 = vset.pattern.permute.xlu0 %v1603_v0  ;;  %v119_v3 = vld [vmem:[#allocation5 + $0x78] sm:$0xff]  ;;  %v118_v4 = vld [vmem:[#allocation5 + $0x70] sm:$0xff]  ;;  %v237_v5 = vld [vmem:[%s2927_s2 + $0x20] sm:$0xff]  ;;  %v1604_v63 = vmov 0.0  }
   0x7   :  { %1474 = vset.pattern.permute.xlu2 %v1603_v0  ;;  %257 = vperm.xlu1 %1473, %v235_v1   ;;  %v236_v6 = vld [vmem:[%s2927_s2 + $0x18] sm:$0xff]  ;;  %v234_v7 = vld [vmem:[%s2927_s2 + $0x8] sm:$0xff]  ;;  %v116_v10 = vld [vmem:[#allocation5 + $0x60] sm:$0xff]  ;;  %v1729_v51 = vshrl.u32 %v358_v50, 7  ;;  %v1732_v53 = vand.u32 127, %v358_v50  ;;  %v2976_v50 = vmov 0 }
   0x8   :  { %251 = vperm.xlu0 %1472, %v233_v2   ;;  %120 = vmatpush.xpose.msra.mxu0 %v119_v3  ;;  %v117_v8 = vld [vmem:[#allocation5 + $0x68] sm:$0xff]  ;;  %v239_v11 = vld [vmem:[%s2927_s2 + $0x30] sm:$0xff]  ;;  %v240_v12 = vld [vmem:[%s2927_s2 + $0x38] sm:$0xff] }
   0x9   :  { %1419 = vmatpush.xpose.msra.mxu1 %v119_v3  ;;  %1420 = vmatpush.xpose.msra.mxu2 %v119_v3  ;;  %v238_v9 = vld [vmem:[%s2927_s2 + $0x28] sm:$0xff]  ;;  %v115_v13 = vld [vmem:[#allocation5 + $0x58] sm:$0xff]  ;;  %v241_v14 = vld [vmem:[%s2927_s2 + $0x40] sm:$0xff]  ;;  %v361_v52 = vadd.s32 16, %v1729_v51  ;;  %vm2930_vm1 = vcmp.lt.s32.totalorder %v1732_v53, 16  ;;  %vm396_vm2 = vcmp.ne.s32.totalorder %v1729_v51, %v1732_v53  ;;  %v364_v57 = vadd.s32 40, %v1729_v51 }
   0xa   :  { %1421 = vmatpush.xpose.msra.mxu3 %v119_v3  ;;  %263 = vperm.xlu2 %1474, %v237_v5   ;;  %v114_v15 = vld [vmem:[#allocation5 + $0x50] sm:$0xff]  ;;  %v242_v16 = vld [vmem:[%s2927_s2 + $0x48] sm:$0xff]  ;;  %v244_v19 = vld [vmem:[%s2927_s2 + $0x58] sm:$0xff]  ;;  %v362_v61 = vadd.s32 24, %v1729_v51  ;;  %v360_v62 = vadd.s32 8, %v1729_v51 }
   0xb   :  { %v243_v17 = vld [vmem:[%s2927_s2 + $0x50] sm:$0xff]  ;;  %v113_v18 = vld [vmem:[#allocation5 + $0x48] sm:$0xff]  ;;  %v112_v20 = vld [vmem:[#allocation5 + $0x40] sm:$0xff]  ;;  %vm398_vm0 = vcmp.ne.s32.totalorder %v361_v52, %v1732_v53  ;;  %vm401_vm8 = vcmp.ne.s32.totalorder %v364_v57, %v1732_v53 }
   0xc   :  { %121 = vmatpush.xpose.msra.mxu0 %v118_v4  ;;  %v245_v21 = vld [vmem:[%s2927_s2 + $0x60] sm:$0xff]  ;;  %v246_v22 = vld [vmem:[%s2927_s2 + $0x68] sm:$0xff]  ;;  %v111_v23 = vld [vmem:[#allocation5 + $0x38] sm:$0xff]  ;;  %vm399_vm9 = vcmp.ne.s32.totalorder %v362_v61, %v1732_v53  ;;  %vm397_vm10 = vcmp.ne.s32.totalorder %v360_v62, %v1732_v53  ;;  %v374_v61 = vadd.s32 120, %v1729_v51 }
   0xd   :  { %1422 = vmatpush.xpose.msra.mxu1 %v118_v4  ;;  %1423 = vmatpush.xpose.msra.mxu2 %v118_v4  ;;  %v247_v24 = vld [vmem:[%s2927_s2 + $0x70] sm:$0xff]  ;;  %v248_v26 = vld [vmem:[%s2927_s2 + $0x78] sm:$0xff]  ;;  %v109_v27 = vld [vmem:[#allocation5 + $0x28] sm:$0xff] }
   0xe   :  { %1424 = vmatpush.xpose.msra.mxu3 %v118_v4  ;;  %v110_v25 = vld [vmem:[#allocation5 + $0x30] sm:$0xff]  ;;  %v108_v28 = vld [vmem:[#allocation5 + $0x20] sm:$0xff]  ;;  %v107_v29 = vld [vmem:[#allocation5 + $0x18] sm:$0xff] }
   0xf   :  { %260 = vperm.xlu1 %1473, %v236_v6   ;;  %v106_v30 = vld [vmem:[#allocation5 + $0x10] sm:$0xff]  ;;  %v105_v31 = vld [vmem:[#allocation5 + $0x8] sm:$0xff]  ;;  %v104_v32 = vld [vmem:[#allocation5] sm:$0xff] }
  0x10   :  { %254 = vperm.xlu0 %1472, %v234_v7   ;;  %122 = vmatpush.xpose.msra.mxu0 %v117_v8  ;;  %v88_v33 = vld [vmem:[%s2925_s0] sm:$0xff]  ;;  %v89_v37 = vld [vmem:[%s2925_s0 + $0x8] sm:$0xff]  ;;  %v90_v41 = vld [vmem:[%s2925_s0 + $0x10] sm:$0xff]  ;;  %v2959_v7 = vmov 0 }
  0x11   :  { %1425 = vmatpush.xpose.msra.mxu1 %v117_v8  ;;  %1426 = vmatpush.xpose.msra.mxu2 %v117_v8  ;;  %v92_v34 = vld [vmem:[%s2925_s0 + $0x20] sm:$0xff]  ;;  %v93_v38 = vld [vmem:[%s2925_s0 + $0x28] sm:$0xff]  ;;  %v94_v42 = vld [vmem:[%s2925_s0 + $0x30] sm:$0xff] }
  0x12   :  { %1427 = vmatpush.xpose.msra.mxu3 %v117_v8  ;;  %266 = vperm.xlu2 %1474, %v238_v9   ;;  %v96_v35 = vld [vmem:[%s2925_s0 + $0x40] sm:$0xff]  ;;  %v97_v39 = vld [vmem:[%s2925_s0 + $0x48] sm:$0xff]  ;;  %v98_v43 = vld [vmem:[%s2925_s0 + $0x50] sm:$0xff]  ;;  %v367_v8 = vadd.s32 64, %v1729_v51 }
  0x13   :  { %v100_v36 = vld [vmem:[%s2925_s0 + $0x60] sm:$0xff]  ;;  %v101_v40 = vld [vmem:[%s2925_s0 + $0x68] sm:$0xff]  ;;  %v102_v44 = vld [vmem:[%s2925_s0 + $0x70] sm:$0xff] }
  0x14   :  { %123 = vmatpush.xpose.msra.mxu0 %v116_v10  ;;  %v91_v45 = vld [vmem:[%s2925_s0 + $0x18] sm:$0xff]  ;;  %v1739_v55 = vld [vmem:[%s2928_s3] ss:$0 sm:$0xff]  ;;  %vm1745_vm3 = vmand %vm398_vm0, %vm2930_vm1 }
  0x15   :  { %1428 = vmatpush.xpose.msra.mxu1 %v116_v10  ;;  %1429 = vmatpush.xpose.msra.mxu2 %v116_v10  ;;  %v95_v46 = vld [vmem:[%s2925_s0 + $0x38] sm:$0xff]  ;;  %v2954_v56 = vsel %vm1745_vm3, 4294967295, %v2953_v56  ;;  %vm1752_vm4 = vmand %vm396_vm2, %vm2930_vm1  ;;  %vm404_vm2 = vcmp.ne.s32.totalorder %v367_v8, %v1732_v53 }
  0x16   :  { %1430 = vmatpush.xpose.msra.mxu3 %v116_v10  ;;  %v99_v47 = vld [vmem:[%s2925_s0 + $0x58] sm:$0xff]  ;;  %vm1781_vm11 = vmand %vm401_vm8, %vm2930_vm1 }
  0x17   :  { %272 = vperm.xlu1 %1473, %v240_v12   ;;  %v103_v48 = vld [vmem:[%s2925_s0 + $0x78] sm:$0xff]  ;;  %vm1787_vm12 = vmand %vm399_vm9, %vm2930_vm1  ;;  %v363_v12 = vadd.s32 32, %v1729_v51 }
  0x18   :  { %269 = vperm.xlu0 %1472, %v239_v11   ;;  %124 = vmatpush.xpose.msra.mxu0 %v115_v13  ;;  %v2960_v7 = vsel %vm1787_vm12, 4294967295, %v2959_v7  ;;  %vm1794_vm13 = vmand %vm397_vm10, %vm2930_vm1 }
  0x19   :  { %1431 = vmatpush.xpose.msra.mxu1 %v115_v13  ;;  %1432 = vmatpush.xpose.msra.mxu2 %v115_v13  ;;  %vm1827_vm8 = vmand %vm404_vm2, %vm2930_vm1 }
  0x1a   :  { %1433 = vmatpush.xpose.msra.mxu3 %v115_v13  ;;  %275 = vperm.xlu2 %1474, %v241_v14   ;;  %v365_v14 = vadd.s32 48, %v1729_v51 }
  0x1c   :  { %125 = vmatpush.xpose.msra.mxu0 %v114_v15 }
  0x1d   :  { %1434 = vmatpush.xpose.msra.mxu1 %v114_v15  ;;  %1435 = vmatpush.xpose.msra.mxu2 %v114_v15 }
  0x1e   :  { %1436 = vmatpush.xpose.msra.mxu3 %v114_v15 }
  0x1f   :  { %281 = vperm.xlu1 %1473, %v243_v17  }
  0x20   :  { %278 = vperm.xlu0 %1472, %v242_v16   ;;  %126 = vmatpush.xpose.msra.mxu0 %v113_v18 }
  0x21   :  { %1437 = vmatpush.xpose.msra.mxu1 %v113_v18  ;;  %1438 = vmatpush.xpose.msra.mxu2 %v113_v18 }
  0x22   :  { %1439 = vmatpush.xpose.msra.mxu3 %v113_v18  ;;  %284 = vperm.xlu2 %1474, %v244_v19  }
  0x24   :  { %127 = vmatpush.xpose.msra.mxu0 %v112_v20 }
  0x25   :  { %1440 = vmatpush.xpose.msra.mxu1 %v112_v20  ;;  %1441 = vmatpush.xpose.msra.mxu2 %v112_v20 }
  0x26   :  { %1442 = vmatpush.xpose.msra.mxu3 %v112_v20 }
  0x27   :  { %290 = vperm.xlu1 %1473, %v246_v22  }
  0x28   :  { %287 = vperm.xlu0 %1472, %v245_v21   ;;  %128 = vmatpush.xpose.msra.mxu0 %v111_v23 }
  0x29   :  { %1443 = vmatpush.xpose.msra.mxu1 %v111_v23  ;;  %1444 = vmatpush.xpose.msra.mxu2 %v111_v23 }
  0x2a   :  { %1445 = vmatpush.xpose.msra.mxu3 %v111_v23  ;;  %293 = vperm.xlu2 %1474, %v247_v24   ;;  %v370_v24 = vadd.s32 88, %v1729_v51 }
  0x2c   :  { %129 = vmatpush.xpose.msra.mxu0 %v110_v25 }
  0x2d   :  { %1446 = vmatpush.xpose.msra.mxu1 %v110_v25  ;;  %1447 = vmatpush.xpose.msra.mxu2 %v110_v25 }
  0x2e   :  { %1448 = vmatpush.xpose.msra.mxu3 %v110_v25 }
  0x30   :  { %296 = vperm.xlu0 %1472, %v248_v26   ;;  %130 = vmatpush.xpose.msra.mxu0 %v109_v27 }
  0x31   :  { %1449 = vmatpush.xpose.msra.mxu1 %v109_v27  ;;  %1450 = vmatpush.xpose.msra.mxu2 %v109_v27 }
  0x32   :  { %1451 = vmatpush.xpose.msra.mxu3 %v109_v27  ;;  %v2967_v27 = vmov 0 }
  0x34   :  { %131 = vmatpush.xpose.msra.mxu0 %v108_v28 }
  0x35   :  { %1452 = vmatpush.xpose.msra.mxu1 %v108_v28  ;;  %1453 = vmatpush.xpose.msra.mxu2 %v108_v28 }
  0x36   :  { %1454 = vmatpush.xpose.msra.mxu3 %v108_v28  ;;  %v366_v28 = vadd.s32 56, %v1729_v51 }
  0x38   :  { %132 = vmatpush.xpose.msra.mxu0 %v107_v29 }
  0x39   :  { %1455 = vmatpush.xpose.msra.mxu1 %v107_v29  ;;  %1456 = vmatpush.xpose.msra.mxu2 %v107_v29 }
  0x3a   :  { %1457 = vmatpush.xpose.msra.mxu3 %v107_v29 }
  0x3c   :  { %133 = vmatpush.xpose.msra.mxu0 %v106_v30 }
  0x3d   :  { %1458 = vmatpush.xpose.msra.mxu1 %v106_v30  ;;  %1459 = vmatpush.xpose.msra.mxu2 %v106_v30 }
  0x3e   :  { %1460 = vmatpush.xpose.msra.mxu3 %v106_v30  ;;  %v368_v30 = vadd.s32 72, %v1729_v51 }
  0x40   :  { %134 = vmatpush.xpose.msra.mxu0 %v105_v31 }
  0x41   :  { %1461 = vmatpush.xpose.msra.mxu1 %v105_v31  ;;  %1462 = vmatpush.xpose.msra.mxu2 %v105_v31 }
  0x42   :  { %1463 = vmatpush.xpose.msra.mxu3 %v105_v31 }
  0x44   :  { %135 = vmatpush.xpose.msra.mxu0 %v104_v32 }
  0x45   :  { %1464 = vmatpush.xpose.msra.mxu1 %v104_v32  ;;  %1465 = vmatpush.xpose.msra.mxu2 %v104_v32 }
  0x46   :  { %1466 = vmatpush.xpose.msra.mxu3 %v104_v32 }
  0x47   :  { %136 = vmatmul.f32.vlgmr.msra.gmra.mxu0 %v88_v33 }
  0x48   :  { %148 = vmatmul.f32.vlgmr.msra.gmra.mxu1 %v92_v34  ;;  %160 = vmatmul.f32.vlgmr.msra.gmra.mxu2 %v96_v35  ;;  %v2969_v35 = vmov 0 }
  0x49   :  { %172 = vmatmul.f32.vlgmr.msra.gmra.mxu3 %v100_v36 }
  0x4f   :  { %139 = vmatmul.f32.gmra.mxu0 %v89_v37  ;;  %v2971_v37 = vmov 0 }
  0x50   :  { %151 = vmatmul.f32.gmra.mxu1 %v93_v38  ;;  %163 = vmatmul.f32.gmra.mxu2 %v97_v39  ;;  %v373_v38 = vadd.s32 112, %v1729_v51 }
  0x51   :  { %175 = vmatmul.f32.gmra.mxu3 %v101_v40 }
  0x57   :  { %142 = vmatmul.f32.gmra.mxu0 %v90_v41 }
  0x58   :  { %154 = vmatmul.f32.gmra.mxu1 %v94_v42  ;;  %166 = vmatmul.f32.gmra.mxu2 %v98_v43  ;;  %v369_v42 = vadd.s32 80, %v1729_v51 }
  0x59   :  { %178 = vmatmul.f32.gmra.mxu3 %v102_v44 }
  0x5f   :  { %145 = vmatmul.f32.gmra.mxu0 %v91_v45  ;;  %v371_v45 = vadd.s32 96, %v1729_v51 }
  0x60   :  { %157 = vmatmul.f32.gmra.mxu1 %v95_v46  ;;  %169 = vmatmul.f32.gmra.mxu2 %v99_v47 }
  0x61   :  { %181 = vmatmul.f32.gmra.mxu3 %v103_v48 }
  0x64   :  { %v264_v49 = vpop.permute.xlu2 %263 }
  0x6c   :  { %v267_v54 = vpop.permute.xlu2 %266 }
  0x6d   :  { %vm304_vm7 = vcmp.eq.s32.totalorder %v267_v54, %v1739_v55 }
  0x6e   :  { %v1777_v5 = vsel %vm304_vm7, 1.0, %v1604_v63  ;;  %vm402_vm7 = vcmp.ne.s32.totalorder %v365_v14, %v1732_v53 }
  0x6f   :  { %v643_v13 = vsel %vm1781_vm11, %v1777_v5, 0.0  ;;  %vm1843_vm10 = vmand %vm402_vm7, %vm2930_vm1 }
  0x70   :  { %v2968_v27 = vsel %vm1843_vm10, 4294967295, %v2967_v27 }
  0x74   :  { %v276_v4 = vpop.permute.xlu2 %275 }
  0x75   :  { %vm307_vm0 = vcmp.eq.s32.totalorder %v276_v4, %v1739_v55 }
  0x76   :  { %v1823_v19 = vsel %vm307_vm0, 1.0, %v1604_v63  ;;  %vm407_vm0 = vcmp.ne.s32.totalorder %v370_v24, %v1732_v53 }
  0x77   :  { %v646_v29 = vsel %vm1827_vm8, %v1823_v19, 0.0  ;;  %vm1872_vm7 = vmand %vm407_vm0, %vm2930_vm1 }
  0x78   :  { %v2970_v35 = vsel %vm1872_vm7, 4294967295, %v2969_v35 }
  0x79   :  { %v258_v58 = vpop.permute.xlu1 %257 }
  0x7a   :  { %v252_v59 = vpop.permute.xlu0 %251  ;;  %vm301_vm5 = vcmp.eq.s32.totalorder %v258_v58, %v1739_v55 }
  0x7b   :  { %vm299_vm6 = vcmp.eq.s32.totalorder %v252_v59, %v1739_v55  ;;  %v1761_v0 = vsel %vm301_vm5, 1.0, %v1604_v63  ;;  %vm303_vm5 = vcmp.eq.s32.totalorder %v264_v49, %v1739_v55 }
  0x7c   :  { %v1764_v1 = vsel %vm299_vm6, 1.0, %v1604_v63  ;;  %v640_v2 = vsel %vm1745_vm3, %v1761_v0, 0.0  ;;  %vm400_vm6 = vcmp.ne.s32.totalorder %v363_v12, %v1732_v53  ;;  %v285_v21 = vpop.permute.xlu2 %284  ;;  %v1832_v22 = vsel %vm303_vm5, 1.0, %v1604_v63 }
  0x7d   :  { %v638_v3 = vsel %vm1752_vm4, %v1764_v1, 0.0  ;;  %658 = vadd.xlane.f32.xlu2 %v640_v2  ;;  %vm1836_vm9 = vmand %vm400_vm6, %vm2930_vm1  ;;  %vm403_vm5 = vcmp.ne.s32.totalorder %v366_v28, %v1732_v53  ;;  %vm405_vm6 = vcmp.ne.s32.totalorder %v368_v30, %v1732_v53 }
  0x7e   :  { %654 = vadd.xlane.f32.xlu0 %v638_v3  ;;  %v642_v31 = vsel %vm1836_vm9, %v1832_v22, 0.0  ;;  %v372_v3 = vadd.s32 104, %v1729_v51 }
  0x81   :  { %v261_v9 = vpop.permute.xlu1 %260 }
  0x82   :  { %v255_v10 = vpop.permute.xlu0 %254  ;;  %vm302_vm14 = vcmp.eq.s32.totalorder %v261_v9, %v1739_v55 }
  0x83   :  { %vm300_vm15 = vcmp.eq.s32.totalorder %v255_v10, %v1739_v55  ;;  %v1806_v15 = vsel %vm302_vm14, 1.0, %v1604_v63 }
  0x84   :  { %v1809_v16 = vsel %vm300_vm15, 1.0, %v1604_v63  ;;  %v641_v17 = vsel %vm1787_vm12, %v1806_v15, 0.0  ;;  %vm310_vm15 = vcmp.eq.s32.totalorder %v285_v21, %v1739_v55  ;;  %v294_v41 = vpop.permute.xlu2 %293 }
  0x85   :  { %v639_v18 = vsel %vm1794_vm13, %v1809_v16, 0.0  ;;  %664 = vadd.xlane.f32.xlu2 %v643_v13  ;;  %v1868_v34 = vsel %vm310_vm15, 1.0, %v1604_v63  ;;  %vm1888_vm15 = vmand %vm405_vm6, %vm2930_vm1 }
  0x86   :  { %660 = vadd.xlane.f32.xlu0 %v641_v17  ;;  %656 = vadd.xlane.f32.xlu1 %v639_v18  ;;  %v649_v44 = vsel %vm1872_vm7, %v1868_v34, 0.0  ;;  %vm408_vm7 = vcmp.ne.s32.totalorder %v371_v45, %v1732_v53 }
  0x89   :  { %v273_v26 = vpop.permute.xlu1 %272 }
  0x8a   :  { %v270_v25 = vpop.permute.xlu0 %269  ;;  %vm306_vm2 = vcmp.eq.s32.totalorder %v273_v26, %v1739_v55 }
  0x8b   :  { %vm305_vm14 = vcmp.eq.s32.totalorder %v270_v25, %v1739_v55  ;;  %v1877_v36 = vsel %vm306_vm2, 1.0, %v1604_v63  ;;  %vm313_vm2 = vcmp.eq.s32.totalorder %v294_v41, %v1739_v55 }
  0x8c   :  { %v1857_v32 = vsel %vm305_vm14, 1.0, %v1604_v63  ;;  %vm1881_vm14 = vmand %vm403_vm5, %vm2930_vm1  ;;  %vm410_vm5 = vcmp.ne.s32.totalorder %v373_v38, %v1732_v53  ;;  %vm406_vm1 = vcmp.ne.s32.totalorder %v369_v42, %v1732_v53  ;;  %v1913_v49 = vsel %vm313_vm2, 1.0, %v1604_v63 }
  0x8d   :  { %v644_v33 = vsel %vm1843_vm10, %v1857_v32, 0.0  ;;  %670 = vadd.xlane.f32.xlu2 %v646_v29  ;;  %v2972_v37 = vsel %vm1881_vm14, 4294967295, %v2971_v37  ;;  %v645_v46 = vsel %vm1881_vm14, %v1877_v36, 0.0 }
  0x8e   :  { %666 = vadd.xlane.f32.xlu0 %v644_v33  ;;  %662 = vadd.xlane.f32.xlu1 %v642_v31 }
  0x91   :  { %v282_v43 = vpop.permute.xlu1 %281 }
  0x92   :  { %v279_v39 = vpop.permute.xlu0 %278  ;;  %vm309_vm6 = vcmp.eq.s32.totalorder %v282_v43, %v1739_v55 }
  0x93   :  { %vm308_vm0 = vcmp.eq.s32.totalorder %v279_v39, %v1739_v55  ;;  %v1922_v52 = vsel %vm309_vm6, 1.0, %v1604_v63 }
  0x94   :  { %v1902_v47 = vsel %vm308_vm0, 1.0, %v1604_v63  ;;  %vm2975_vm0 = vcmp.lt.s32.totalorder %v1732_v53, 16 }
  0x95   :  { %v647_v48 = vsel %vm1888_vm15, %v1902_v47, 0.0  ;;  %676 = vadd.xlane.f32.xlu2 %v649_v44  ;;  %vm1917_vm14 = vmand %vm410_vm5, %vm2975_vm0 }
  0x96   :  { %672 = vadd.xlane.f32.xlu0 %v647_v48  ;;  %668 = vadd.xlane.f32.xlu1 %v645_v46  ;;  %v2977_v50 = vsel %vm1917_vm14, 4294967295, %v2976_v50  ;;  %vm2978_vm12 = vmmov %vm2975_vm0  ;;  %v652_v59 = vsel %vm1917_vm14, %v1913_v49, 0.0 }
  0x97   :  { %vm1926_vm10 = vmand %vm406_vm1, %vm2978_vm12  ;;  %vm411_vm1 = vcmp.ne.s32.totalorder %v374_v61, %v1732_v53  ;;  %vm409_vm12 = vcmp.ne.s32.totalorder %v372_v3, %v1732_v53 }
  0x98   :  { %vm2981_vm3 = vmmov %vm2975_vm0  ;;  %v648_v62 = vsel %vm1926_vm10, %v1922_v52, 0.0 }
  0x99   :  { %vm1932_vm2 = vmand %vm408_vm7, %vm2981_vm3  ;;  %v291_v4 = vpop.permute.xlu1 %290 }
  0x9a   :  { %v288_v57 = vpop.permute.xlu0 %287  ;;  %vm312_vm3 = vcmp.eq.s32.totalorder %v291_v4, %v1739_v55  ;;  %vm2984_vm7 = vmmov %vm2975_vm0 }
  0x9b   :  { %vm311_vm5 = vcmp.eq.s32.totalorder %v288_v57, %v1739_v55  ;;  %vm1953_vm6 = vmand %vm411_vm1, %vm2984_vm7  ;;  %v1959_v51 = vsel %vm312_vm3, 1.0, %v1604_v63  ;;  %vm39_vm1 = vcmask 7168  }
  0x9c   :  { %v327_v2 = vsel %vm311_vm5, 1.0, %v1604_v63  ;;  %vm2987_vm5 = vmmov %vm2984_vm7  ;;  %74 = vst.msk [vmem:[#allocation4 + $0x10] sm:$0xff] %vm39_vm1, %v1604_v63 }
  0x9d   :  { %v650_v8 = vsel %vm1932_vm2, %v327_v2, 0.0  ;;  %682 = vadd.xlane.f32.xlu2 %v652_v59  ;;  %vm1963_vm14 = vmand %vm409_vm12, %vm2987_vm5  ;;  %40 = vst.msk [vmem:[#allocation2] sm:$0xff] %vm39_vm1, %v1604_v63 }
  0x9e   :  { %678 = vadd.xlane.f32.xlu0 %v650_v8  ;;  %674 = vadd.xlane.f32.xlu1 %v648_v62  ;;  %41 = vst.msk [vmem:[#allocation2 + $0x8] sm:$0xff] %vm39_vm1, %v1604_v63 }
  0x9f   :  { %42 = vst.msk [vmem:[#allocation2 + $0x10] sm:$0xff] %vm39_vm1, %v1604_v63 }
  0xa0   :  { %43 = vst.msk [vmem:[#allocation2 + $0x18] sm:$0xff] %vm39_vm1, %v1604_v63 }
  0xa1   :  { %44 = vst.msk [vmem:[#allocation2 + $0x20] sm:$0xff] %vm39_vm1, %v1604_v63 }
  0xa2   :  { %v297_v9 = vpop.permute.xlu0 %296  ;;  %45 = vst.msk [vmem:[#allocation2 + $0x28] sm:$0xff] %vm39_vm1, %v1604_v63 }
  0xa3   :  { %vm314_vm0 = vcmp.eq.s32.totalorder %v297_v9, %v1739_v55  ;;  %v651_v55 = vsel %vm1963_vm14, %v1959_v51, 0.0  ;;  %46 = vst.msk [vmem:[#allocation2 + $0x30] sm:$0xff] %vm39_vm1, %v1604_v63 }
  0xa4   :  { %v1968_v13 = vsel %vm314_vm0, 1.0, %v1604_v63  ;;  %47 = vst.msk [vmem:[#allocation2 + $0x38] sm:$0xff] %vm39_vm1, %v1604_v63 }
  0xa5   :  { %v653_v14 = vsel %vm1953_vm6, %v1968_v13, 0.0  ;;  %48 = vst.msk [vmem:[#allocation2 + $0x40] sm:$0xff] %vm39_vm1, %v1604_v63 }
  0xa6   :  { %684 = vadd.xlane.f32.xlu0 %v653_v14  ;;  %680 = vadd.xlane.f32.xlu1 %v651_v55  ;;  %49 = vst.msk [vmem:[#allocation2 + $0x48] sm:$0xff] %vm39_vm1, %v1604_v63 }
  0xa7   :  { %50 = vst.msk [vmem:[#allocation2 + $0x50] sm:$0xff] %vm39_vm1, %v1604_v63 }
  0xa8   :  { %51 = vst.msk [vmem:[#allocation2 + $0x58] sm:$0xff] %vm39_vm1, %v1604_v63 }
  0xa9   :  { %52 = vst.msk [vmem:[#allocation2 + $0x60] sm:$0xff] %vm39_vm1, %v1604_v63 }
  0xaa   :  { %53 = vst.msk [vmem:[#allocation2 + $0x68] sm:$0xff] %vm39_vm1, %v1604_v63 }
  0xab   :  { %54 = vst.msk [vmem:[#allocation2 + $0x70] sm:$0xff] %vm39_vm1, %v1604_v63 }
  0xac   :  { %55 = vst.msk [vmem:[#allocation2 + $0x78] sm:$0xff] %vm39_vm1, %v1604_v63 }
  0xad   :  { %56 = vst.msk [vmem:[#allocation3] sm:$0xff] %vm39_vm1, %v1604_v63 }
  0xae   :  { %57 = vst.msk [vmem:[#allocation3 + $0x8] sm:$0xff] %vm39_vm1, %v1604_v63 }
  0xaf   :  { %58 = vst.msk [vmem:[#allocation3 + $0x10] sm:$0xff] %vm39_vm1, %v1604_v63 }
  0xb0   :  { %59 = vst.msk [vmem:[#allocation3 + $0x18] sm:$0xff] %vm39_vm1, %v1604_v63 }
  0xb1   :  { %60 = vst.msk [vmem:[#allocation3 + $0x20] sm:$0xff] %vm39_vm1, %v1604_v63 }
  0xb2   :  { %61 = vst.msk [vmem:[#allocation3 + $0x28] sm:$0xff] %vm39_vm1, %v1604_v63 }
  0xb3   :  { %62 = vst.msk [vmem:[#allocation3 + $0x30] sm:$0xff] %vm39_vm1, %v1604_v63 }
  0xb4   :  { %63 = vst.msk [vmem:[#allocation3 + $0x38] sm:$0xff] %vm39_vm1, %v1604_v63 }
  0xb5   :  { %64 = vst.msk [vmem:[#allocation3 + $0x40] sm:$0xff] %vm39_vm1, %v1604_v63 }
  0xb6   :  { %65 = vst.msk [vmem:[#allocation3 + $0x48] sm:$0xff] %vm39_vm1, %v1604_v63 }
  0xb7   :  { %66 = vst.msk [vmem:[#allocation3 + $0x50] sm:$0xff] %vm39_vm1, %v1604_v63 }
  0xb8   :  { %67 = vst.msk [vmem:[#allocation3 + $0x58] sm:$0xff] %vm39_vm1, %v1604_v63 }
  0xb9   :  { %68 = vst.msk [vmem:[#allocation3 + $0x60] sm:$0xff] %vm39_vm1, %v1604_v63 }
  0xba   :  { %69 = vst.msk [vmem:[#allocation3 + $0x68] sm:$0xff] %vm39_vm1, %v1604_v63 }
  0xbb   :  { %70 = vst.msk [vmem:[#allocation3 + $0x70] sm:$0xff] %vm39_vm1, %v1604_v63 }
  0xbc   :  { %71 = vst.msk [vmem:[#allocation3 + $0x78] sm:$0xff] %vm39_vm1, %v1604_v63 }
  0xbd   :  { %72 = vst.msk [vmem:[#allocation4] sm:$0xff] %vm39_vm1, %v1604_v63 }
  0xbe   :  { %73 = vst.msk [vmem:[#allocation4 + $0x8] sm:$0xff] %vm39_vm1, %v1604_v63 }
  0xbf   :  { %75 = vst.msk [vmem:[#allocation4 + $0x18] sm:$0xff] %vm39_vm1, %v1604_v63 }
  0xc0   :  { %76 = vst.msk [vmem:[#allocation4 + $0x20] sm:$0xff] %vm39_vm1, %v1604_v63 }
  0xc1   :  { %77 = vst.msk [vmem:[#allocation4 + $0x28] sm:$0xff] %vm39_vm1, %v1604_v63 }
  0xc2   :  { %78 = vst.msk [vmem:[#allocation4 + $0x30] sm:$0xff] %vm39_vm1, %v1604_v63 }
  0xc3   :  { %79 = vst.msk [vmem:[#allocation4 + $0x38] sm:$0xff] %vm39_vm1, %v1604_v63 }
  0xc4   :  { %v137_v17 = vpop.f32.mrf.mxu0  ;;  %80 = vst.msk [vmem:[#allocation4 + $0x40] sm:$0xff] %vm39_vm1, %v1604_v63 }
  0xc5   :  { %v149_v18 = vpop.f32.mrf.mxu1  ;;  %v331_v53 = vmul.f32 %v1764_v1, %v137_v17  ;;  %v1403_v24 = vadd.f32 -14.285714, %v137_v17  ;;  %81 = vst.msk [vmem:[#allocation4 + $0x48] sm:$0xff] %vm39_vm1, %v1604_v63 }
  0xc6   :  { %v335_v21 = vmul.f32 %v1832_v22, %v149_v18  ;;  %v1407_v42 = vadd.f32 -14.285714, %v149_v18  ;;  %82 = vst.msk [vmem:[#allocation4 + $0x50] sm:$0xff] %vm39_vm1, %v1604_v63 }
  0xc7   :  { %v542_v26 = vsel %vm1752_vm4, %v331_v53, 0.0  ;;  %v201_v28 = vmul.f32 1.442695, %v1403_v24  ;;  %83 = vst.msk [vmem:[#allocation4 + $0x58] sm:$0xff] %vm39_vm1, %v1604_v63 }
  0xc8   :  { %v546_v25 = vsel %vm1836_vm9, %v335_v21, 0.0  ;;  %558 = vadd.xlane.f32.xlu1 %v542_v26  ;;  %84 = vst.msk [vmem:[#allocation4 + $0x60] sm:$0xff] %vm39_vm1, %v1604_v63 }
  0xc9   :  { %566 = vadd.xlane.f32.xlu2 %v546_v25  ;;  %1476 = vpow2.f32 %v201_v28  ;;  %85 = vst.msk [vmem:[#allocation4 + $0x68] sm:$0xff] %vm39_vm1, %v1604_v63 }
  0xca   :  { %86 = vst.msk [vmem:[#allocation4 + $0x70] sm:$0xff] %vm39_vm1, %v1604_v63 }
  0xcb   :  { %v161_v29 = vpop.f32.mrf.mxu2  ;;  %87 = vst.msk [vmem:[#allocation4 + $0x78] sm:$0xff] %vm39_vm1, %v1604_v63 }
  0xcc   :  { %v173_v30 = vpop.f32.mrf.mxu3  ;;  %v339_v31 = vmul.f32 %v1823_v19, %v161_v29  ;;  %v140_v1 = vpop.f32.mrf.mxu0  ;;  %v1411_v45 = vadd.f32 -14.285714, %v161_v29 }
  0xcd   :  { %v1415_v33 = vadd.f32 -14.285714, %v173_v30  ;;  %v1983_v38 = vmul.f32 %v327_v2, %v173_v30  ;;  %v152_v39 = vpop.f32.mrf.mxu1  ;;  %v332_v22 = vmul.f32 %v1809_v16, %v140_v1  ;;  %v1404_v62 = vadd.f32 -14.285714, %v140_v1 }
  0xce   :  { %v336_v41 = vmul.f32 %v1777_v5, %v152_v39  ;;  %v550_v46 = vsel %vm1827_vm8, %v339_v31, 0.0  ;;  %v209_v5 = vmul.f32 1.442695, %v1407_v42  ;;  %v217_v16 = vmul.f32 1.442695, %v1411_v45 }
  0xcf   :  { %v225_v43 = vmul.f32 1.442695, %v1415_v33  ;;  %v554_v44 = vsel %vm1932_vm2, %v1983_v38, 0.0  ;;  %v543_v48 = vsel %vm1794_vm13, %v332_v22, 0.0  ;;  %v1477_v59 = vpop.eup %1476  ;;  %v203_v60 = vmul.f32 1.442695, %v1404_v62 }
  0xd0   :  { %v547_v19 = vsel %vm1781_vm11, %v336_v41, 0.0  ;;  %574 = vadd.xlane.f32.xlu1 %v550_v46  ;;  %v445_v4 = vsel %vm1752_vm4, %v1477_v59, 0.0  ;;  %v1408_v25 = vadd.f32 -14.285714, %v152_v39  ;;  %vm2990_vm4 = vnez %v2954_v56  ;;  %v530_v38 = vld [vmem:[#allocation3 + $0x20] sm:$0xff] }
  0xd1   :  { %568 = vadd.xlane.f32.xlu0 %v547_v19  ;;  %1478 = vpow2.f32 %v225_v43  ;;  %560 = vadd.xlane.f32.xlu2 %v543_v48 }
  0xd2   :  { %1480 = vpow2.f32 %v209_v5  ;;  %v211_v33 = vmul.f32 1.442695, %v1408_v25 }
  0xd3   :  { %v164_v57 = vpop.f32.mrf.mxu2  ;;  %1482 = vpow2.f32 %v217_v16 }
  0xd4   :  { %v340_v61 = vmul.f32 %v1902_v47, %v164_v57  ;;  %v1412_v3 = vadd.f32 -14.285714, %v164_v57  ;;  %v2009_v8 = vpop.f32.mrf.mxu3  ;;  %v143_v14 = vpop.f32.mrf.mxu0  ;;  %1484 = vpow2.f32 %v203_v60 }
  0xd5   :  { %v1416_v18 = vadd.f32 -14.285714, %v2009_v8  ;;  %v333_v53 = vmul.f32 %v1761_v0, %v143_v14  ;;  %v1405_v24 = vadd.f32 -14.285714, %v143_v14  ;;  %v155_v28 = vpop.f32.mrf.mxu1  ;;  %v344_v54 = vmul.f32 %v1959_v51, %v2009_v8 }
  0xd6   :  { %v551_v9 = vsel %vm1888_vm15, %v340_v61, 0.0  ;;  %v219_v55 = vmul.f32 1.442695, %v1412_v3  ;;  %v337_v20 = vmul.f32 %v1857_v32, %v155_v28  ;;  %v1409_v22 = vadd.f32 -14.285714, %v155_v28  ;;  %v624_v61 = vld [vmem:[#allocation4 + $0x10] sm:$0xff] }
  0xd7   :  { %v1479_v2 = vpop.eup %1478  ;;  %v227_v0 = vmul.f32 1.442695, %v1416_v18  ;;  %v544_v30 = vsel %vm2990_vm4, %v333_v53, 0.0  ;;  %v205_v31 = vmul.f32 1.442695, %v1405_v24 }
  0xd8   :  { %v457_v47 = vsel %vm1932_vm2, %v1479_v2, 0.0  ;;  %461 = vadd.xlane.f32.xlu1 %v445_v4  ;;  %v1481_v17 = vpop.eup %1480  ;;  %1486 = vpow2.f32 %v219_v55  ;;  %v213_v43 = vmul.f32 1.442695, %v1409_v22 }
  0xd9   :  { %485 = vadd.xlane.f32.xlu0 %v457_v47  ;;  %576 = vadd.xlane.f32.xlu2 %v551_v9  ;;  %v1483_v21 = vpop.eup %1482  ;;  %v449_v26 = vsel %vm1836_vm9, %v1481_v17, 0.0  ;;  %1488 = vpow2.f32 %v227_v0  ;;  %vm2994_vm9 = vnez %v2977_v50 }
  0xda   :  { %v453_v29 = vsel %vm1827_vm8, %v1483_v21, 0.0  ;;  %v1485_v1 = vpop.eup %1484  ;;  %1490 = vpow2.f32 %v205_v31  ;;  %vm2991_vm8 = vnez %v2968_v27 }
  0xdb   :  { %1492 = vpow2.f32 %v211_v33  ;;  %v548_v32 = vsel %vm2991_vm8, %v337_v20, 0.0  ;;  %v446_v41 = vsel %vm1794_vm13, %v1485_v1, 0.0  ;;  %v2068_v19 = vpop.f32.mrf.mxu2  ;;  %vm2993_vm13 = vnez %v2972_v37  ;;  %v622_v20 = vld [vmem:[#allocation4] sm:$0xff] }
  0xdc   :  { %v2043_v23 = vpop.f32.mrf.mxu3  ;;  %v1413_v46 = vadd.f32 -14.285714, %v2068_v19  ;;  %1494 = vpow2.f32 %v213_v43  ;;  %v146_v2 = vpop.f32.mrf.mxu0  ;;  %v625_v43 = vld [vmem:[#allocation4 + $0x18] sm:$0xff] }
  0xdd   :  { %v1417_v40 = vadd.f32 -14.285714, %v2043_v23  ;;  %v158_v9 = vpop.f32.mrf.mxu1  ;;  %v334_v6 = vmul.f32 %v1806_v15, %v146_v2  ;;  %v1406_v18 = vadd.f32 -14.285714, %v146_v2  ;;  %v628_v2 = vld [vmem:[#allocation4 + $0x30] sm:$0xff] }
  0xde   :  { %v1487_v39 = vpop.eup %1486  ;;  %v221_v62 = vmul.f32 1.442695, %v1413_v46  ;;  %v338_v17 = vmul.f32 %v1877_v36, %v158_v9  ;;  %v1410_v53 = vadd.f32 -14.285714, %v158_v9 }
  0xdf   :  { %v454_v42 = vsel %vm1888_vm15, %v1487_v39, 0.0  ;;  %v1489_v45 = vpop.eup %1488  ;;  %v229_v3 = vmul.f32 1.442695, %v1417_v40  ;;  %v207_v0 = vmul.f32 1.442695, %v1406_v18 }
  0xe0   :  { %469 = vadd.xlane.f32.xlu1 %v449_v26  ;;  %v1491_v11 = vpop.eup %1490  ;;  %v458_v57 = vsel %vm1963_vm14, %v1489_v45, 0.0  ;;  %1496 = vpow2.f32 %v221_v62  ;;  %v549_v21 = vsel %vm2993_vm13, %v338_v17, 0.0  ;;  %v630_v62 = vld [vmem:[#allocation4 + $0x40] sm:$0xff] }
  0xe1   :  { %477 = vadd.xlane.f32.xlu2 %v453_v29  ;;  %562 = vadd.xlane.f32.xlu0 %v544_v30  ;;  %v1493_v5 = vpop.eup %1492  ;;  %v447_v59 = vsel %vm2990_vm4, %v1491_v11, 0.0  ;;  %1498 = vpow2.f32 %v229_v3  ;;  %v215_v29 = vmul.f32 1.442695, %v1410_v53 }
  0xe2   :  { %v450_v4 = vsel %vm1781_vm11, %v1493_v5, 0.0  ;;  %v1495_v55 = vpop.eup %1494  ;;  %vm2992_vm11 = vnez %v2960_v7 }
  0xe3   :  { %v451_v15 = vsel %vm2991_vm8, %v1495_v55, 0.0  ;;  %v545_v36 = vsel %vm2992_vm11, %v334_v6, 0.0  ;;  %v2124_v31 = vpop.f32.mrf.mxu2 }
  0xe4   :  { %v2076_v48 = vpop.f32.mrf.mxu3  ;;  %v1414_v33 = vadd.f32 -14.285714, %v2124_v31 }
  0xe5   :  { %v1418_v16 = vadd.f32 -14.285714, %v2076_v48 }
  0xe6   :  { %v1497_v26 = vpop.eup %1496  ;;  %v223_v46 = vmul.f32 1.442695, %v1414_v33 }
  0xe7   :  { %v231_v14 = vmul.f32 1.442695, %v1418_v16  ;;  %v1499_v28 = vpop.eup %1498  ;;  %v455_v1 = vsel %vm1926_vm10, %v1497_v26, 0.0  ;;  %v555_v26 = vsel %vm1963_vm14, %v344_v54, 0.0 }
  0xe8   :  { %570 = vadd.xlane.f32.xlu1 %v548_v32  ;;  %v459_v39 = vsel %vm2994_vm9, %v1499_v28, 0.0  ;;  %v623_v32 = vld [vmem:[#allocation4 + $0x8] sm:$0xff] }
  0xe9   :  { %463 = vadd.xlane.f32.xlu2 %v446_v41  ;;  %479 = vadd.xlane.f32.xlu0 %v454_v42  ;;  %1500 = vpow2.f32 %v231_v14  ;;  %v627_v42 = vld [vmem:[#allocation4 + $0x28] sm:$0xff]  ;;  %v633_v14 = vld [vmem:[#allocation4 + $0x58] sm:$0xff] }
  0xea   :  { %1502 = vpow2.f32 %v207_v0  ;;  %v632_v0 = vld [vmem:[#allocation4 + $0x50] sm:$0xff] }
  0xeb   :  { %1504 = vpow2.f32 %v215_v29 }
  0xec   :  { %1506 = vpow2.f32 %v223_v46 }
  0xef   :  { %v1501_v30 = vpop.eup %1500 }
  0xf0   :  { %487 = vadd.xlane.f32.xlu1 %v458_v57  ;;  %v659_v47 = vpop.xlane.xlu2 %658  ;;  %v460_v22 = vsel %vm1953_vm6, %v1501_v30, 0.0  ;;  %v626_v57 = vld [vmem:[#allocation4 + $0x20] sm:$0xff] }
  0xf1   :  { %v655_v56 = vpop.xlane.xlu0 %654  ;;  %471 = vadd.xlane.f32.xlu2 %v450_v4  ;;  %465 = vadd.xlane.f32.xlu0 %v447_v59  ;;  %v688_v60 = vadd.f32 %v659_v47, %v624_v61  ;;  %v1503_v59 = vpop.eup %1502  ;;  %v341_v4 = vmul.f32 %v1922_v52, %v2068_v19  ;;  %v629_v19 = vld [vmem:[#allocation4 + $0x38] sm:$0xff] }
  0xf2   :  { %v686_v41 = vadd.f32 %v655_v56, %v622_v20  ;;  %v1505_v3 = vpop.eup %1504  ;;  %v448_v63 = vsel %vm2992_vm11, %v1503_v59, 0.0  ;;  %v637_v20 = vld [vmem:[#allocation4 + $0x78] sm:$0xff] }
  0xf3   :  { %704 = vst.msk [vmem:[#allocation4 + $0x10] sm:$0xff] %vm39_vm1, %v688_v60  ;;  %v631_v60 = vld [vmem:[#allocation4 + $0x48] sm:$0xff]  ;;  %v452_v52 = vsel %vm2993_vm13, %v1505_v3, 0.0  ;;  %v552_v55 = vsel %vm1926_vm10, %v341_v4, 0.0  ;;  %vm2995_vm10 = vnez %v2970_v35  ;;  %v634_v35 = vld [vmem:[#allocation4 + $0x60] sm:$0xff] }
  0xf4   :  { %702 = vst.msk [vmem:[#allocation4] sm:$0xff] %vm39_vm1, %v686_v41 }
  0xf8   :  { %564 = vadd.xlane.f32.xlu1 %v545_v36  ;;  %v665_v24 = vpop.xlane.xlu2 %664  ;;  %v342_v36 = vmul.f32 %v1868_v34, %v2124_v31  ;;  %v635_v31 = vld [vmem:[#allocation4 + $0x68] sm:$0xff] }
  0xf9   :  { %v661_v25 = vpop.xlane.xlu0 %660  ;;  %572 = vadd.xlane.f32.xlu2 %v549_v21  ;;  %473 = vadd.xlane.f32.xlu0 %v451_v15  ;;  %v657_v27 = vpop.xlane.xlu1 %656  ;;  %v691_v40 = vadd.f32 %v665_v24, %v627_v42 }
  0xfa   :  { %v687_v16 = vadd.f32 %v657_v27, %v623_v32  ;;  %v689_v61 = vadd.f32 %v661_v25, %v625_v43  ;;  %v1507_v15 = vpop.eup %1506  ;;  %v553_v24 = vsel %vm2995_vm10, %v342_v36, 0.0  ;;  %v636_v25 = vld [vmem:[#allocation4 + $0x70] sm:$0xff]  ;;  %v345_v27 = vmul.f32 %v1913_v49, %v2043_v23 }
  0xfb   :  { %707 = vst.msk [vmem:[#allocation4 + $0x28] sm:$0xff] %vm39_vm1, %v691_v40  ;;  %v456_v21 = vsel %vm2995_vm10, %v1507_v15, 0.0  ;;  %v346_v49 = vmul.f32 %v1968_v13, %v2076_v48  ;;  %v2194_v58 = vld [vmem:[#allocation4 + $0x10] sm:$0xff]  ;;  %v2200_v48 = vld [vmem:[#allocation4] sm:$0xff] }
  0xfc   :  { %703 = vst.msk [vmem:[#allocation4 + $0x8] sm:$0xff] %vm39_vm1, %v687_v16  ;;  %v556_v12 = vsel %vm2994_vm9, %v345_v27, 0.0  ;;  %v2197_v13 = vadd.f32 1e-07, %v2194_v58  ;;  %v2205_v43 = vadd.f32 1e-07, %v2200_v48 }
  0xfd   :  { %705 = vst.msk [vmem:[#allocation4 + $0x18] sm:$0xff] %vm39_vm1, %v689_v61  ;;  %v557_v50 = vsel %vm1953_vm6, %v346_v49, 0.0  ;;  %v535_v27 = vld [vmem:[#allocation3 + $0x48] sm:$0xff] }
  0xfe   :  { %2996 = vst [vmem:[#allocation8_spill] sm:$0xff] %v2194_v58  ;;  %1508 = vrcp.f32 %v2197_v13  ;;  %vm1130_vm14 = vweird.f32 %v2205_v43 }
  0xff   :  { %1510 = vrcp.f32 %v2205_v43 }
 0x100   :  { %481 = vadd.xlane.f32.xlu1 %v455_v1  ;;  %v671_v45 = vpop.xlane.xlu2 %670 }
 0x101   :  { %v667_v11 = vpop.xlane.xlu0 %666  ;;  %489 = vadd.xlane.f32.xlu2 %v459_v39  ;;  %491 = vadd.xlane.f32.xlu0 %v460_v22  ;;  %v663_v5 = vpop.xlane.xlu1 %662  ;;  %v694_v47 = vadd.f32 %v671_v45, %v630_v62  ;;  %v531_v62 = vld [vmem:[#allocation3 + $0x28] sm:$0xff] }
 0x102   :  { %v690_v56 = vadd.f32 %v663_v5, %v626_v57  ;;  %v692_v9 = vadd.f32 %v667_v11, %v628_v2  ;;  %v2202_v22 = vld [vmem:[#allocation4 + $0x28] sm:$0xff]  ;;  %v534_v2 = vld [vmem:[#allocation3 + $0x40] sm:$0xff] }
 0x103   :  { %710 = vst.msk [vmem:[#allocation4 + $0x40] sm:$0xff] %vm39_vm1, %v694_v47  ;;  %v2210_v11 = vadd.f32 1e-07, %v2202_v22  ;;  %v2217_v5 = vld [vmem:[#allocation4 + $0x8] sm:$0xff] }
 0x104   :  { %706 = vst.msk [vmem:[#allocation4 + $0x20] sm:$0xff] %vm39_vm1, %v690_v56  ;;  %v2215_v40 = vpop.eup %1508  ;;  %v968_v16 = vld [vmem:[#allocation4 + $0x18] sm:$0xff]  ;;  %v2233_v4 = vadd.f32 1e-07, %v2217_v5  ;;  %v527_v56 = vld [vmem:[#allocation3 + $0x8] sm:$0xff] }
 0x105   :  { %708 = vst.msk [vmem:[#allocation4 + $0x30] sm:$0xff] %vm39_vm1, %v692_v9  ;;  %v1156_v3 = vmul.f32 %v2215_v40, %v2197_v13  ;;  %1512 = vrcp.f32 %v2210_v11  ;;  %v2235_v9 = vadd.f32 1e-07, %v968_v16  ;;  %vm1205_vm10 = vweird.f32 %v2210_v11 }
 0x106   :  { %vm1145_vm3 = vweird.f32 %v2233_v4 }
 0x108   :  { %475 = vadd.xlane.f32.xlu1 %v452_v52  ;;  %v677_v6 = vpop.xlane.xlu2 %676 }
 0x109   :  { %v673_v17 = vpop.xlane.xlu0 %672  ;;  %578 = vadd.xlane.f32.xlu0 %v552_v55  ;;  %467 = vadd.xlane.f32.xlu2 %v448_v63  ;;  %v697_v7 = vadd.f32 %v677_v6, %v633_v14  ;;  %v669_v18 = vpop.xlane.xlu1 %668  ;;  %v1166_v6 = vand.u32 2147483648, %v2197_v13 }
 0x10a   :  { %v695_v53 = vadd.f32 %v673_v17, %v631_v60  ;;  %v693_v37 = vadd.f32 %v669_v18, %v629_v19  ;;  %v2207_v45 = vld [vmem:[#allocation4 + $0x40] sm:$0xff]  ;;  %v1157_v18 = vsub.f32 1.0, %v1156_v3 }
 0x10b   :  { %713 = vst.msk [vmem:[#allocation4 + $0x58] sm:$0xff] %vm39_vm1, %v697_v7  ;;  %v2212_v46 = vld [vmem:[#allocation4 + $0x20] sm:$0xff]  ;;  %v2221_v57 = vadd.f32 1e-07, %v2207_v45 }
 0x10c   :  { %709 = vst.msk [vmem:[#allocation4 + $0x38] sm:$0xff] %vm39_vm1, %v693_v37  ;;  %v2225_v59 = vadd.f32 1e-07, %v2212_v46  ;;  %v2227_v61 = vld [vmem:[#allocation4 + $0x30] sm:$0xff]  ;;  %v1136_v37 = vand.u32 2147483648, %v2205_v43 }
 0x10d   :  { %711 = vst.msk [vmem:[#allocation4 + $0x48] sm:$0xff] %vm39_vm1, %v695_v53  ;;  %1514 = vrcp.f32 %v2221_v57  ;;  %v2239_v60 = vadd.f32 1e-07, %v2227_v61  ;;  %v2247_v53 = vpop.eup %1510  ;;  %vm1250_vm2 = vweird.f32 %v2221_v57 }
 0x10e   :  { %2997 = vst [vmem:[#allocation9_spill] sm:$0xff] %v2227_v61  ;;  %1516 = vrcp.f32 %v2225_v59  ;;  %v2254_v36 = vpop.eup %1512  ;;  %vm1190_vm15 = vweird.f32 %v2225_v59  ;;  %vm1131_vm12 = vweird.f32 %v2247_v53  ;;  %v1254_v61 = vand.u32 2147483647, %v2221_v57 }
 0x10f   :  { %1518 = vrcp.f32 %v2233_v4  ;;  %vm2388_vm6 = vmor %vm1130_vm14, %vm1131_vm12  ;;  %vm1160_vm14 = vweird.f32 %v2197_v13 }
 0x110   :  { %580 = vadd.xlane.f32.xlu1 %v553_v24  ;;  %v683_v34 = vpop.xlane.xlu2 %682  ;;  %1520 = vrcp.f32 %v2235_v9  ;;  %v429_v24 = vld [vmem:[#allocation2] sm:$0xff] }
 0x111   :  { %584 = vadd.xlane.f32.xlu0 %v555_v26  ;;  %483 = vadd.xlane.f32.xlu2 %v456_v21  ;;  %v675_v51 = vpop.xlane.xlu1 %674  ;;  %v700_v8 = vadd.f32 %v683_v34, %v636_v25  ;;  %v679_v29 = vpop.xlane.xlu0 %678  ;;  %1522 = vrcp.f32 %v2239_v60  ;;  %v2260_v21 = vor.u32 1.1754944e-38, %v1166_v6  ;;  %v2266_v26 = vmul.f32 %v2215_v40, %v1157_v18 }
 0x112   :  { %v696_v28 = vadd.f32 %v675_v51, %v632_v0  ;;  %v698_v30 = vadd.f32 %v679_v29, %v634_v35  ;;  %v976_v47 = vld [vmem:[#allocation4 + $0x58] sm:$0xff]  ;;  %v1126_v34 = vmul.f32 %v2247_v53, %v2205_v43  ;;  %v1211_v0 = vand.u32 2147483648, %v2210_v11 }
 0x113   :  { %716 = vst.msk [vmem:[#allocation4 + $0x70] sm:$0xff] %vm39_vm1, %v700_v8  ;;  %v2243_v17 = vadd.f32 1e-07, %v976_v47  ;;  %v2251_v15 = vld [vmem:[#allocation4 + $0x38] sm:$0xff]  ;;  %v2263_v25 = vpop.eup %1514  ;;  %v441_v8 = vld [vmem:[#allocation2 + $0x60] sm:$0xff]  ;;  %v2276_v29 = vor.u32 1.1754944e-38, %v1136_v37  ;;  %v1201_v35 = vmul.f32 %v2254_v36, %v2210_v11 }
 0x114   :  { %712 = vst.msk [vmem:[#allocation4 + $0x50] sm:$0xff] %vm39_vm1, %v696_v28  ;;  %v2257_v54 = vld [vmem:[#allocation4 + $0x48] sm:$0xff]  ;;  %v2272_v51 = vadd.f32 1e-07, %v2251_v15  ;;  %v2274_v28 = vpop.eup %1516  ;;  %v1127_v16 = vsub.f32 1.0, %v1126_v34  ;;  %v433_v34 = vld [vmem:[#allocation2 + $0x20] sm:$0xff]  ;;  %vm1251_vm5 = vweird.f32 %v2263_v25 }
 0x115   :  { %714 = vst.msk [vmem:[#allocation4 + $0x60] sm:$0xff] %vm39_vm1, %v698_v30  ;;  %1524 = vrcp.f32 %v2243_v17  ;;  %v2282_v30 = vadd.f32 1e-07, %v2257_v54  ;;  %v1202_v47 = vsub.f32 1.0, %v1201_v35  ;;  %vm1191_vm7 = vweird.f32 %v2274_v28  ;;  %vm2432_vm9 = vmor %vm1250_vm2, %vm1251_vm5 }
 0x116   :  { %2998 = vst [vmem:[#allocation10_spill] sm:$0xff] %v2243_v17  ;;  %1526 = vrcp.f32 %v2272_v51  ;;  %vm2400_vm0 = vmor %vm1190_vm15, %vm1191_vm7  ;;  %vm2468_vm2 = vcmp.eq.f32.partialorder %v1254_v61, 8.507059e+37  ;;  %v434_v61 = vld [vmem:[#allocation2 + $0x28] sm:$0xff]  ;;  %vm1220_vm7 = vweird.f32 %v2239_v60 }
 0x117   :  { %2999 = vst [vmem:[#allocation11_spill] sm:$0xff] %v2251_v15  ;;  %1528 = vrcp.f32 %v2282_v30  ;;  %vm1265_vm13 = vweird.f32 %v2282_v30 }
 0x118   :  { %586 = vadd.xlane.f32.xlu1 %v556_v12  ;;  %v1151_v12 = vand.u32 2147483648, %v2233_v4 }
 0x119   :  { %582 = vadd.xlane.f32.xlu2 %v554_v44  ;;  %v681_v23 = vpop.xlane.xlu1 %680  ;;  %v685_v33 = vpop.xlane.xlu0 %684  ;;  %v526_v44 = vld [vmem:[#allocation3] sm:$0xff] }
 0x11a   :  { %v699_v1 = vadd.f32 %v681_v23, %v635_v31  ;;  %v701_v39 = vadd.f32 %v685_v33, %v637_v20  ;;  %v2284_v23 = vpop.eup %1518  ;;  %v1181_v31 = vand.u32 2147483648, %v2235_v9  ;;  %v1256_v33 = vand.u32 2147483648, %v2221_v57 }
 0x11b   :  { %v1196_v20 = vand.u32 2147483648, %v2225_v59  ;;  %v2320_v6 = vld [vmem:[#allocation4 + $0x50] sm:$0xff]  ;;  %vm1146_vm11 = vweird.f32 %v2284_v23 }
 0x11c   :  { %715 = vst.msk [vmem:[#allocation4 + $0x68] sm:$0xff] %vm39_vm1, %v699_v1  ;;  %vm2460_vm15 = vmor %vm1145_vm3, %vm1146_vm11 }
 0x11d   :  { %717 = vst.msk [vmem:[#allocation4 + $0x78] sm:$0xff] %vm39_vm1, %v701_v39  ;;  %v2323_v18 = vor.u32 1.1754944e-38, %v1196_v20 }
 0x11e   :  { %3003 = vst [vmem:[#allocation15_spill] sm:$0xff] %v2320_v6 }
 0x121   :  { %588 = vadd.xlane.f32.xlu2 %v557_v50 }
 0x13b   :  { %v559_v32 = vpop.xlane.xlu1 %558 }
 0x13c   :  { %v567_v10 = vpop.xlane.xlu2 %566  ;;  %v590_v42 = vadd.f32 %v559_v32, %v526_v44  ;;  %v1246_v44 = vmul.f32 %v2263_v25, %v2221_v57 }
 0x13d   :  { %v594_v41 = vadd.f32 %v567_v10, %v530_v38  ;;  %v2289_v38 = vpop.eup %1520  ;;  %v1226_v10 = vand.u32 2147483648, %v2239_v60 }
 0x13e   :  { %606 = vst.msk [vmem:[#allocation3] sm:$0xff] %vm39_vm1, %v590_v42  ;;  %v2294_v42 = vpop.eup %1522 }
 0x13f   :  { %610 = vst.msk [vmem:[#allocation3 + $0x20] sm:$0xff] %vm39_vm1, %v594_v41  ;;  %v2302_v3 = vpop.eup %1524  ;;  %v1216_v37 = vmul.f32 %v2294_v42, %v2239_v60 }
 0x140   :  { %3000 = vst [vmem:[#allocation12_spill] sm:$0xff] %v2302_v3 }
 0x141   :  { %v1217_v20 = vsub.f32 1.0, %v1216_v37 }
 0x143   :  { %v575_v14 = vpop.xlane.xlu1 %574 }
 0x144   :  { %v569_v63 = vpop.xlane.xlu0 %568  ;;  %v598_v19 = vadd.f32 %v575_v14, %v534_v2  ;;  %v561_v55 = vpop.xlane.xlu2 %560  ;;  %v1186_v2 = vmul.f32 %v2274_v28, %v2225_v59  ;;  %v2310_v14 = vld [vmem:[#allocation4 + $0x70] sm:$0xff] }
 0x145   :  { %v595_v52 = vadd.f32 %v569_v63, %v531_v62  ;;  %v591_v7 = vadd.f32 %v561_v55, %v527_v56  ;;  %v2296_v62 = vor.u32 1.1754944e-38, %v1211_v0  ;;  %v1141_v56 = vmul.f32 %v2284_v23, %v2233_v4  ;;  %3001 = vst [vmem:[#allocation13_spill] sm:$0xff] %v2310_v14 }
 0x146   :  { %614 = vst.msk [vmem:[#allocation3 + $0x40] sm:$0xff] %vm39_vm1, %v598_v19  ;;  %v2307_v63 = vor.u32 1.1754944e-38, %v1151_v12  ;;  %v2315_v19 = vor.u32 1.1754944e-38, %v1181_v31  ;;  %v2317_v55 = vor.u32 1.1754944e-38, %v1256_v33  ;;  %v1128_v0 = vmul.f32 %v2247_v53, %v1127_v16  ;;  %v437_v12 = vld [vmem:[#allocation2 + $0x40] sm:$0xff] }
 0x147   :  { %611 = vst.msk [vmem:[#allocation3 + $0x28] sm:$0xff] %vm39_vm1, %v595_v52  ;;  %v1171_v52 = vmul.f32 %v2289_v38, %v2235_v9  ;;  %v2333_v35 = vadd.f32 1e-07, %v2310_v14  ;;  %v2336_v31 = vmul.f32 %v2254_v36, %v1202_v47  ;;  %v1142_v33 = vsub.f32 1.0, %v1141_v56 }
 0x148   :  { %607 = vst.msk [vmem:[#allocation3 + $0x8] sm:$0xff] %vm39_vm1, %v591_v7  ;;  %v1247_v7 = vsub.f32 1.0, %v1246_v44 }
 0x149   :  { %3002 = vst [vmem:[#allocation14_spill] sm:$0xff] %v2315_v19  ;;  %v1172_v44 = vsub.f32 1.0, %v1171_v52  ;;  %1530 = vrcp.f32 %v2333_v35 }
 0x14a   :  { %v1248_v56 = vmul.f32 %v2263_v25, %v1247_v7  ;;  %v1134_v7 = vand.u32 2147483647, %v2205_v43 }
 0x14b   :  { %v462_v49 = vpop.xlane.xlu1 %461 }
 0x14c   :  { %v486_v1 = vpop.xlane.xlu0 %485  ;;  %v493_v50 = vadd.f32 %v462_v49, %v429_v24  ;;  %v577_v39 = vpop.xlane.xlu2 %576  ;;  %v2327_v24 = vor.u32 1.1754944e-38, %v1226_v10  ;;  %v528_v49 = vld [vmem:[#allocation3 + $0x10] sm:$0xff]  ;;  %v1241_v10 = vand.u32 2147483648, %v2272_v51  ;;  %v1249_v43 = vadd.f32 %v2263_v25, %v1248_v56 }
 0x14d   :  { %v505_v32 = vadd.f32 %v486_v1, %v441_v8  ;;  %v599_v41 = vadd.f32 %v577_v39, %v535_v27  ;;  %v1187_v8 = vsub.f32 1.0, %v1186_v2  ;;  %v1291_v27 = vmul.f32 %v2302_v3, %v2243_v17  ;;  %v2343_v39 = vpop.eup %1526 }
 0x14e   :  { %510 = vst.msk [vmem:[#allocation2] sm:$0xff] %vm39_vm1, %v493_v50  ;;  %v2341_v1 = vadd.f32 1e-07, %v2320_v6  ;;  %v2347_v47 = vpop.eup %1528  ;;  %vm2409_vm4 = vcmp.eq.f32.partialorder %v1134_v7, 8.507059e+37 }
 0x14f   :  { %522 = vst.msk [vmem:[#allocation2 + $0x60] sm:$0xff] %vm39_vm1, %v505_v32  ;;  %v1271_v32 = vand.u32 2147483648, %v2282_v30  ;;  %v1188_v6 = vmul.f32 %v2274_v28, %v1187_v8  ;;  %v1292_v52 = vsub.f32 1.0, %v1291_v27  ;;  %v2362_v37 = vmul.f32 %v2347_v47, %v2282_v30  ;;  %v2364_v8 = vld [vmem:[#allocation4 + $0x60] sm:$0xff] }
 0x150   :  { %615 = vst.msk [vmem:[#allocation3 + $0x48] sm:$0xff] %vm39_vm1, %v599_v41  ;;  %1532 = vrcp.f32 %v2341_v1  ;;  %v1143_v27 = vmul.f32 %v2284_v23, %v1142_v33  ;;  %vm1266_vm12 = vweird.f32 %v2347_v47 }
 0x151   :  { %3004 = vst [vmem:[#allocation16_spill] sm:$0xff] %v2364_v8  ;;  %v1189_v33 = vadd.f32 %v2274_v28, %v1188_v6  ;;  %v2406_v6 = vpop.eup %1530  ;;  %vm2531_vm5 = vmor %vm1265_vm13, %vm1266_vm12  ;;  %vm1221_vm13 = vweird.f32 %v2294_v42  ;;  %vm1175_vm12 = vweird.f32 %v2235_v9 }
 0x152   :  { %v1144_v57 = vadd.f32 %v2284_v23, %v1143_v27 }
 0x153   :  { %v470_v50 = vpop.xlane.xlu1 %469 }
 0x154   :  { %v497_v41 = vadd.f32 %v470_v50, %v433_v34  ;;  %v478_v16 = vpop.xlane.xlu2 %477  ;;  %v563_v2 = vpop.xlane.xlu0 %562  ;;  %v1231_v34 = vmul.f32 %v2343_v39, %v2272_v51  ;;  %v532_v50 = vld [vmem:[#allocation3 + $0x30] sm:$0xff] }
 0x155   :  { %v981_v14 = vld [vmem:[#allocation2] sm:$0xff]  ;;  %v501_v15 = vadd.f32 %v478_v16, %v437_v12  ;;  %v592_v17 = vadd.f32 %v563_v2, %v528_v49  ;;  %v2371_v12 = vmul.f32 %v2289_v38, %v1172_v44  ;;  %v2373_v49 = vor.u32 1.1754944e-38, %v1241_v10  ;;  %v430_v44 = vld [vmem:[#allocation2 + $0x8] sm:$0xff] }
 0x156   :  { %v997_v19 = vadd.f32 1e-07, %v981_v14  ;;  %514 = vst.msk [vmem:[#allocation2 + $0x20] sm:$0xff] %vm39_vm1, %v497_v41  ;;  %v1194_v14 = vand.u32 2147483647, %v2225_v59  ;;  %v2378_v41 = vmul.f32 %v2294_v42, %v1217_v20  ;;  %v1129_v16 = vadd.f32 %v2247_v53, %v1128_v0  ;;  %v438_v10 = vld [vmem:[#allocation2 + $0x48] sm:$0xff] }
 0x157   :  { %518 = vst.msk [vmem:[#allocation2 + $0x40] sm:$0xff] %vm39_vm1, %v501_v15  ;;  %v2375_v15 = vor.u32 1.1754944e-38, %v1271_v32  ;;  %v1232_v32 = vsub.f32 1.0, %v1231_v34  ;;  %v2394_v20 = vadd.f32 1e-07, %v2364_v8  ;;  %v1061_v8 = vld [vmem:[#allocation3] sm:$0xff] }
 0x158   :  { %1534 = vlog2.f32 %v997_v19  ;;  %608 = vst.msk [vmem:[#allocation3 + $0x10] sm:$0xff] %vm39_vm1, %v592_v17  ;;  %v2381_v19 = vmul.f32 %v2302_v3, %v1292_v52  ;;  %v1262_v52 = vsub.f32 1.0, %v2362_v37  ;;  %vm2413_vm8 = vcmp.eq.f32.partialorder %v1194_v14, 8.507059e+37 }
 0x159   :  { %3005 = vst [vmem:[#allocation17_spill] sm:$0xff] %v2371_v12  ;;  %v1133_v14 = vsel %vm2388_vm6, %v2247_v53, %v1129_v16  ;;  %1536 = vrcp.f32 %v2394_v20  ;;  %v2440_v53 = vld [vmem:[#allocation4 + $0x68] sm:$0xff]  ;;  %v2446_v17 = vmul.f32 %v2343_v39, %v1232_v32  ;;  %vm1206_vm6 = vweird.f32 %v2254_v36 }
 0x15a   :  { %3006 = vst [vmem:[#allocation18_spill] sm:$0xff] %v2373_v49  ;;  %v2417_v49 = vpop.eup %1532  ;;  %v1263_v0 = vmul.f32 %v2347_v47, %v1262_v52  ;;  %v1148_v52 = vsel %vm2460_vm15, %v2284_v23, %v1144_v57  ;;  %vm1235_vm15 = vweird.f32 %v2272_v51 }
 0x15b   :  { %3007 = vst [vmem:[#allocation19_spill] sm:$0xff] %v2381_v19  ;;  %v571_v2 = vpop.xlane.xlu1 %570 }
 0x15c   :  { %v596_v59 = vadd.f32 %v571_v2, %v532_v50  ;;  %v464_v3 = vpop.xlane.xlu2 %463  ;;  %v480_v19 = vpop.xlane.xlu0 %479  ;;  %v1193_v50 = vsel %vm2400_vm0, %v2274_v28, %v1189_v33  ;;  %v2450_v33 = vmul.f32 %v2406_v6, %v2333_v35  ;;  %vm1161_vm0 = vweird.f32 %v2215_v40 }
 0x15d   :  { %v985_v56 = vld [vmem:[#allocation2 + $0x20] sm:$0xff]  ;;  %v494_v12 = vadd.f32 %v464_v3, %v430_v44  ;;  %v502_v37 = vadd.f32 %v480_v19, %v438_v10  ;;  %v1149_v19 = vand.u32 2147483647, %v2233_v4  ;;  %v2454_v44 = vmul.f32 %v2417_v49, %v2341_v1  ;;  %vm2566_vm11 = vmor %vm1160_vm14, %vm1161_vm0 }
 0x15e   :  { %v1535_v7 = vpop.eup %1534  ;;  %v1001_v58 = vadd.f32 1e-07, %v985_v56  ;;  %v989_v2 = vld [vmem:[#allocation2 + $0x40] sm:$0xff]  ;;  %612 = vst.msk [vmem:[#allocation3 + $0x30] sm:$0xff] %vm39_vm1, %v596_v59  ;;  %v1253_v10 = vsel %vm2432_vm9, %v2263_v25, %v1249_v43  ;;  %v2474_v4 = vadd.f32 1e-07, %v2440_v53  ;;  %v1138_v56 = vsel %vm2409_vm4, %v2276_v29, %v1133_v14  ;;  %vm2541_vm4 = vmor %vm1205_vm10, %vm1206_vm6 }
 0x15f   :  { %v1014_v28 = vmul.f32 0.6931472, %v1535_v7  ;;  %v1005_v16 = vadd.f32 1e-07, %v989_v2  ;;  %511 = vst.msk [vmem:[#allocation2 + $0x8] sm:$0xff] %vm39_vm1, %v494_v12  ;;  %v2476_v59 = vld [vmem:[#allocation4 + $0x78] sm:$0xff]  ;;  %v2484_v25 = vsel %vm2413_vm8, %v2323_v18, %v1193_v50  ;;  %v2502_v2 = vpop.eup %1536  ;;  %vm2603_vm14 = vmor %vm1220_vm7, %vm1221_vm13  ;;  %vm1281_vm7 = vweird.f32 %v2417_v49 }
 0x160   :  { %1538 = vlog2.f32 %v1001_v58  ;;  %519 = vst.msk [vmem:[#allocation2 + $0x48] sm:$0xff] %vm39_vm1, %v502_v37  ;;  %v442_v58 = vld [vmem:[#allocation2 + $0x68] sm:$0xff]  ;;  %v431_v43 = vld [vmem:[#allocation2 + $0x10] sm:$0xff]  ;;  %vm2490_vm3 = vcmp.eq.f32.partialorder %v1149_v19, 8.507059e+37  ;;  %v1337_v34 = vsub.f32 1.0, %v2450_v33  ;;  %v1277_v18 = vsub.f32 1.0, %v2454_v44 }
 0x161   :  { %v1045_v12 = vadd.f32 14.285714, %v1014_v28  ;;  %1540 = vlog2.f32 %v1005_v16  ;;  %v2506_v3 = vadd.f32 1e-07, %v2476_v59  ;;  %vm1236_vm0 = vweird.f32 %v2343_v39 }
 0x162   :  { %1542 = vrcp.f32 %v2474_v4 }
 0x163   :  { %v1077_v37 = vmul.f32 %v1045_v12, %v2200_v48  ;;  %v488_v29 = vpop.xlane.xlu1 %487  ;;  %v2500_v48 = vsel %vm2468_vm2, %v2317_v55, %v1253_v10  ;;  %v2512_v55 = vsel %vm2490_vm3, %v2307_v63, %v1148_v52  ;;  %v2515_v12 = vadd.f32 %v2347_v47, %v1263_v0 }
 0x164   :  { %v506_v14 = vadd.f32 %v488_v29, %v442_v58  ;;  %v472_v50 = vpop.xlane.xlu2 %471  ;;  %v466_v23 = vpop.xlane.xlu0 %465  ;;  %v1269_v10 = vand.u32 2147483647, %v2282_v30  ;;  %v2523_v63 = vmul.f32 %v2502_v2, %v2394_v20  ;;  %v1159_v30 = vadd.f32 %v2215_v40, %v2266_v26 }
 0x165   :  { %v1093_v19 = vsub.f32 %v1061_v8, %v1077_v37  ;;  %v498_v28 = vadd.f32 %v472_v50, %v434_v61  ;;  %v495_v16 = vadd.f32 %v466_v23, %v431_v43  ;;  %v2537_v8 = vadd.f32 %v2254_v36, %v2336_v31 }
 0x166   :  { %v1539_v57 = vpop.eup %1538  ;;  %v982_v27 = vld [vmem:[#allocation2 + $0x8] sm:$0xff]  ;;  %523 = vst.msk [vmem:[#allocation2 + $0x68] sm:$0xff] %vm39_vm1, %v506_v14  ;;  %v529_v14 = vld [vmem:[#allocation3 + $0x18] sm:$0xff]  ;;  %vm2558_vm8 = vcmp.eq.f32.partialorder %v1269_v10, 8.507059e+37  ;;  %vm1280_vm3 = vweird.f32 %v2341_v1 }
 0x167   :  { %v1541_v32 = vpop.eup %1540  ;;  %v1139_v58 = vmul.f32 %v1138_v56, %v1093_v19  ;;  %v1022_v61 = vmul.f32 0.6931472, %v1539_v57  ;;  %v998_v43 = vadd.f32 1e-07, %v982_v27  ;;  %v990_v37 = vld [vmem:[#allocation2 + $0x48] sm:$0xff]  ;;  %515 = vst.msk [vmem:[#allocation2 + $0x28] sm:$0xff] %vm39_vm1, %v498_v28  ;;  %v1268_v57 = vsel %vm2531_vm5, %v2347_v47, %v2515_v12 }
 0x168   :  { %v1030_v52 = vmul.f32 0.6931472, %v1541_v32  ;;  %v1006_v0 = vadd.f32 1e-07, %v990_v37  ;;  %512 = vst.msk [vmem:[#allocation2 + $0x10] sm:$0xff] %vm39_vm1, %v495_v16  ;;  %v533_v28 = vld [vmem:[#allocation3 + $0x38] sm:$0xff]  ;;  %v2570_v32 = vpop.eup %1542  ;;  %vm1176_vm5 = vweird.f32 %v2289_v38 }
 0x169   :  { %v1365_v7 = vmul.f32 -1.0, %v1139_v58  ;;  %v1049_v29 = vadd.f32 14.285714, %v1022_v61  ;;  %1544 = vlog2.f32 %v998_v43  ;;  %v1209_v19 = vand.u32 2147483647, %v2210_v11  ;;  %v435_v16 = vld [vmem:[#allocation2 + $0x30] sm:$0xff] }
 0x16a   :  { %v1053_v50 = vadd.f32 14.285714, %v1030_v52  ;;  %1546 = vlog2.f32 %v1006_v0  ;;  %v1065_v58 = vld [vmem:[#allocation3 + $0x20] sm:$0xff]  ;;  %v1164_v12 = vand.u32 2147483647, %v2197_v13  ;;  %v1163_v13 = vsel %vm2566_vm11, %v2215_v40, %v1159_v30  ;;  %vm2725_vm11 = vmor %vm1175_vm12, %vm1176_vm5 }
 0x16b   :  { %1548 = vrcp.f32 %v2506_v3  ;;  %1382 = vst.msk [vmem:[%s2929_s4] sm:$0xff] %vm39_vm1, %v1365_v7  ;;  %v1081_v31 = vmul.f32 %v1049_v29, %v2212_v46  ;;  %v565_v27 = vpop.xlane.xlu1 %564  ;;  %v1069_v37 = vld [vmem:[#allocation3 + $0x40] sm:$0xff]  ;;  %v1208_v46 = vsel %vm2541_vm4, %v2254_v36, %v2537_v8  ;;  %vm2580_vm9 = vcmp.eq.f32.partialorder %v1209_v19, 8.507059e+37  ;;  %vm2695_vm4 = vmor %vm1280_vm3, %vm1281_vm7 }
 0x16c   :  { %v1085_v47 = vmul.f32 %v1053_v50, %v2207_v45  ;;  %v573_v10 = vpop.xlane.xlu2 %572  ;;  %v474_v61 = vpop.xlane.xlu0 %473  ;;  %v593_v43 = vadd.f32 %v565_v27, %v529_v14  ;;  %v1219_v36 = vadd.f32 %v2294_v42, %v2378_v41  ;;  %v1224_v8 = vand.u32 2147483647, %v2239_v60 }
 0x16d   :  { %v1097_v52 = vsub.f32 %v1065_v58, %v1081_v31  ;;  %v597_v0 = vadd.f32 %v573_v10, %v533_v28  ;;  %v499_v7 = vadd.f32 %v474_v61, %v435_v16  ;;  %vm2594_vm10 = vcmp.eq.f32.partialorder %v1164_v12, 8.507059e+37  ;;  %v439_v58 = vld [vmem:[#allocation2 + $0x50] sm:$0xff]  ;;  %v444_v61 = vld [vmem:[#allocation2 + $0x78] sm:$0xff] }
 0x16e   :  { %v1101_v29 = vsub.f32 %v1069_v37, %v1085_v47  ;;  %v986_v56 = vld [vmem:[#allocation2 + $0x28] sm:$0xff]  ;;  %609 = vst.msk [vmem:[#allocation3 + $0x18] sm:$0xff] %vm39_vm1, %v593_v43  ;;  %v1273_v27 = vsel %vm2558_vm8, %v2375_v15, %v1268_v57  ;;  %v443_v10 = vld [vmem:[#allocation2 + $0x70] sm:$0xff]  ;;  %v1278_v60 = vmul.f32 %v2417_v49, %v1277_v18  ;;  %v2623_v15 = vsel %vm2580_vm9, %v2296_v62, %v1208_v46  ;;  %vm2708_vm8 = vmor %vm1235_vm15, %vm1236_vm0 }
 0x16f   :  { %v1545_v14 = vpop.eup %1544  ;;  %v1199_v50 = vmul.f32 %v2484_v25, %v1097_v52  ;;  %v1002_v28 = vadd.f32 1e-07, %v986_v56  ;;  %v983_v16 = vld [vmem:[#allocation2 + $0x10] sm:$0xff]  ;;  %613 = vst.msk [vmem:[#allocation3 + $0x38] sm:$0xff] %vm39_vm1, %v597_v0  ;;  %v2628_v57 = vsel %vm2594_vm10, %v2260_v21, %v1163_v13  ;;  %v1223_v44 = vsel %vm2603_vm14, %v2294_v42, %v1219_v36  ;;  %v994_v46 = vld [vmem:[#allocation2 + $0x68] sm:$0xff] }
 0x170   :  { %v1547_v23 = vpop.eup %1546  ;;  %v1259_v19 = vmul.f32 %v2500_v48, %v1101_v29  ;;  %v1016_v31 = vmul.f32 0.6931472, %v1545_v14  ;;  %v999_v26 = vadd.f32 1e-07, %v983_v16  ;;  %516 = vst.msk [vmem:[#allocation2 + $0x30] sm:$0xff] %vm39_vm1, %v499_v7  ;;  %v2635_v43 = vmul.f32 %v2570_v32, %v2474_v4  ;;  %v1062_v0 = vld [vmem:[#allocation3 + $0x8] sm:$0xff] }
 0x171   :  { %v2607_v41 = vpop.eup %1548  ;;  %v1369_v30 = vmul.f32 -1.0, %v1199_v50  ;;  %v1032_v48 = vmul.f32 0.6931472, %v1547_v23  ;;  %1550 = vlog2.f32 %v1002_v28  ;;  %vm2642_vm2 = vcmp.eq.f32.partialorder %v1224_v8, 8.507059e+37  ;;  %v1070_v13 = vld [vmem:[#allocation3 + $0x48] sm:$0xff] }
 0x172   :  { %v1373_v47 = vmul.f32 -1.0, %v1259_v19  ;;  %v1046_v12 = vadd.f32 14.285714, %v1016_v31  ;;  %1552 = vlog2.f32 %v999_v26  ;;  %v1284_v45 = vand.u32 2147483647, %v2341_v1 }
 0x173   :  { %1386 = vst.msk [vmem:[%s2929_s4 + $0x20] sm:$0xff] %vm39_vm1, %v1369_v30  ;;  %v1054_v11 = vadd.f32 14.285714, %v1032_v48  ;;  %v482_v18 = vpop.xlane.xlu1 %481  ;;  %v2656_v50 = vadd.f32 %v2417_v49, %v1278_v60  ;;  %v2662_v8 = vsel %vm2642_vm2, %v2327_v24, %v1223_v44  ;;  %v1286_v23 = vand.u32 2147483648, %v2341_v1  ;;  %v432_v60 = vld [vmem:[#allocation2 + $0x18] sm:$0xff]  ;;  %v3056_v1 = vld [vmem:[#allocation14_spill] sm:$0xff] }
 0x174   :  { %1390 = vst.msk [vmem:[%s2929_s4 + $0x40] sm:$0xff] %vm39_vm1, %v1373_v47  ;;  %v1078_v62 = vmul.f32 %v1046_v12, %v2217_v5  ;;  %v490_v37 = vpop.xlane.xlu2 %489  ;;  %v492_v52 = vpop.xlane.xlu0 %491  ;;  %v503_v42 = vadd.f32 %v482_v18, %v439_v58  ;;  %v2652_v5 = vmul.f32 %v2607_v41, %v2506_v3  ;;  %v2670_v25 = vadd.f32 %v2343_v39, %v2446_v17  ;;  %v436_v47 = vld [vmem:[#allocation2 + $0x38] sm:$0xff]  ;;  %v993_v12 = vld [vmem:[#allocation2 + $0x60] sm:$0xff] }
 0x175   :  { %v1086_v7 = vmul.f32 %v1054_v11, %v2257_v54  ;;  %v507_v29 = vadd.f32 %v490_v37, %v443_v10  ;;  %v508_v56 = vadd.f32 %v492_v52, %v444_v61  ;;  %v1010_v54 = vadd.f32 1e-07, %v994_v46  ;;  %v536_v61 = vld [vmem:[#allocation3 + $0x50] sm:$0xff]  ;;  %v1066_v37 = vld [vmem:[#allocation3 + $0x28] sm:$0xff] }
 0x176   :  { %v1094_v14 = vsub.f32 %v1062_v0, %v1078_v62  ;;  %520 = vst.msk [vmem:[#allocation2 + $0x50] sm:$0xff] %vm39_vm1, %v503_v42  ;;  %v1322_v30 = vsub.f32 1.0, %v2635_v43  ;;  %vm2673_vm6 = vcmp.eq.f32.partialorder %v1284_v45, 8.507059e+37  ;;  %v1352_v17 = vsub.f32 1.0, %v2652_v5  ;;  %v3042_v42 = vld [vmem:[#allocation8_spill] sm:$0xff]  ;;  %v1063_v45 = vld [vmem:[#allocation3 + $0x10] sm:$0xff] }
 0x177   :  { %v1551_v28 = vpop.eup %1550  ;;  %v1102_v16 = vsub.f32 %v1070_v13, %v1086_v7  ;;  %v987_v36 = vld [vmem:[#allocation2 + $0x30] sm:$0xff]  ;;  %524 = vst.msk [vmem:[#allocation2 + $0x70] sm:$0xff] %vm39_vm1, %v507_v29  ;;  %v1009_v52 = vadd.f32 1e-07, %v993_v12  ;;  %vm1325_vm9 = vweird.f32 %v2474_v4  ;;  %vm1326_vm10 = vweird.f32 %v2570_v32 }
 0x178   :  { %v1553_v19 = vpop.eup %1552  ;;  %v1154_v31 = vmul.f32 %v2512_v55, %v1094_v14  ;;  %v1024_v26 = vmul.f32 0.6931472, %v1551_v28  ;;  %v1003_v40 = vadd.f32 1e-07, %v987_v36  ;;  %525 = vst.msk [vmem:[#allocation2 + $0x78] sm:$0xff] %vm39_vm1, %v508_v56  ;;  %vm2780_vm15 = vmor %vm1325_vm9, %vm1326_vm10  ;;  %vm1340_vm3 = vweird.f32 %v2333_v35 }
 0x179   :  { %v1274_v48 = vmul.f32 %v1273_v27, %v1102_v16  ;;  %v1018_v24 = vmul.f32 0.6931472, %v1553_v19  ;;  %v1239_v27 = vand.u32 2147483647, %v2272_v51  ;;  %v1283_v16 = vsel %vm2695_vm4, %v2417_v49, %v2656_v50  ;;  %v3047_v50 = vld [vmem:[#allocation17_spill] sm:$0xff] }
 0x17a   :  { %v1366_v10 = vmul.f32 -1.0, %v1154_v31  ;;  %v1050_v55 = vadd.f32 14.285714, %v1024_v26  ;;  %1554 = vlog2.f32 %v1003_v40  ;;  %v1238_v49 = vsel %vm2708_vm8, %v2343_v39, %v2670_v25 }
 0x17b   :  { %v1374_v11 = vmul.f32 -1.0, %v1274_v48  ;;  %v1047_v44 = vadd.f32 14.285714, %v1018_v24  ;;  %v476_v18 = vpop.xlane.xlu1 %475  ;;  %1556 = vlog2.f32 %v1010_v54  ;;  %v1287_v54 = vor.u32 1.1754944e-38, %v1286_v23  ;;  %v538_v24 = vld [vmem:[#allocation3 + $0x60] sm:$0xff] }
 0x17c   :  { %1383 = vst.msk [vmem:[%s2929_s4 + $0x8] sm:$0xff] %vm39_vm1, %v1366_v10  ;;  %v1082_v43 = vmul.f32 %v1050_v55, %v2202_v22  ;;  %v579_v62 = vpop.xlane.xlu0 %578  ;;  %v500_v46 = vadd.f32 %v476_v18, %v436_v47  ;;  %v468_v21 = vpop.xlane.xlu2 %467  ;;  %v1174_v23 = vadd.f32 %v2289_v38, %v3047_v50  ;;  %v1179_v40 = vand.u32 2147483647, %v2235_v9  ;;  %v537_v47 = vld [vmem:[#allocation3 + $0x58] sm:$0xff]  ;;  %v539_v55 = vld [vmem:[#allocation3 + $0x68] sm:$0xff]  ;;  %v3055_v22 = vld [vmem:[#allocation18_spill] sm:$0xff] }
 0x17d   :  { %1391 = vst.msk [vmem:[%s2929_s4 + $0x48] sm:$0xff] %vm39_vm1, %v1374_v11  ;;  %v1079_v0 = vmul.f32 %v1047_v44, %v3042_v42  ;;  %v991_v7 = vld [vmem:[#allocation2 + $0x50] sm:$0xff]  ;;  %v600_v29 = vadd.f32 %v579_v62, %v536_v61  ;;  %v496_v56 = vadd.f32 %v468_v21, %v432_v60  ;;  %v1323_v39 = vmul.f32 %v2570_v32, %v1322_v30  ;;  %v440_v9 = vld [vmem:[#allocation2 + $0x58] sm:$0xff] }
 0x17e   :  { %v1098_v13 = vsub.f32 %v1066_v37, %v1082_v43  ;;  %v995_v14 = vld [vmem:[#allocation2 + $0x70] sm:$0xff]  ;;  %v1007_v28 = vadd.f32 1e-07, %v991_v7  ;;  %517 = vst.msk [vmem:[#allocation2 + $0x38] sm:$0xff] %vm39_vm1, %v500_v46  ;;  %vm2736_vm13 = vcmp.eq.f32.partialorder %v1239_v27, 8.507059e+37  ;;  %v1178_v58 = vsel %vm2725_vm11, %v2289_v38, %v1174_v23  ;;  %v3054_v38 = vld [vmem:[#allocation9_spill] sm:$0xff] }
 0x17f   :  { %v1095_v36 = vsub.f32 %v1063_v45, %v1079_v0  ;;  %v1011_v19 = vadd.f32 1e-07, %v995_v14  ;;  %616 = vst.msk [vmem:[#allocation3 + $0x50] sm:$0xff] %vm39_vm1, %v600_v29  ;;  %v996_v60 = vld [vmem:[#allocation2 + $0x78] sm:$0xff]  ;;  %vm2749_vm14 = vcmp.eq.f32.partialorder %v1179_v40, 8.507059e+37  ;;  %v1324_v18 = vadd.f32 %v2570_v32, %v1323_v39  ;;  %v1067_v7 = vld [vmem:[#allocation3 + $0x30] sm:$0xff] }
 0x180   :  { %v1555_v31 = vpop.eup %1554  ;;  %v1214_v26 = vmul.f32 %v2623_v15, %v1098_v13  ;;  %1558 = vlog2.f32 %v1007_v28  ;;  %513 = vst.msk [vmem:[#allocation2 + $0x18] sm:$0xff] %vm39_vm1, %v496_v56  ;;  %v2734_v15 = vsel %vm2673_vm6, %v1287_v54, %v1283_v16  ;;  %v1329_v27 = vand.u32 2147483647, %v2474_v4  ;;  %v3059_v50 = vld [vmem:[#allocation19_spill] sm:$0xff]  ;;  %v3060_v23 = vld [vmem:[#allocation12_spill] sm:$0xff]  ;;  %v3073_v39 = vld [vmem:[#allocation13_spill] sm:$0xff] }
 0x181   :  { %v1169_v25 = vmul.f32 %v2628_v57, %v1095_v36  ;;  %v1026_v48 = vmul.f32 0.6931472, %v1555_v31  ;;  %v1557_v12 = vpop.eup %1556  ;;  %1560 = vlog2.f32 %v1009_v52  ;;  %v2763_v56 = vsel %vm2736_vm13, %v3055_v22, %v1238_v49 }
 0x182   :  { %v1370_v10 = vmul.f32 -1.0, %v1214_v26  ;;  %1562 = vlog2.f32 %v1011_v19  ;;  %v1040_v46 = vmul.f32 0.6931472, %v1557_v12  ;;  %v1331_v45 = vand.u32 2147483648, %v2474_v4  ;;  %v3063_v12 = vld [vmem:[#allocation15_spill] sm:$0xff] }
 0x183   :  { %v1367_v57 = vmul.f32 -1.0, %v1169_v25  ;;  %v1051_v30 = vadd.f32 14.285714, %v1026_v48  ;;  %v581_v61 = vpop.xlane.xlu1 %580  ;;  %v1338_v13 = vmul.f32 %v2406_v6, %v1337_v34  ;;  %v1012_v28 = vadd.f32 1e-07, %v996_v60  ;;  %v540_v25 = vld [vmem:[#allocation3 + $0x70] sm:$0xff] }
 0x184   :  { %1387 = vst.msk [vmem:[%s2929_s4 + $0x28] sm:$0xff] %vm39_vm1, %v1370_v10  ;;  %v585_v44 = vpop.xlane.xlu0 %584  ;;  %v601_v43 = vadd.f32 %v581_v61, %v537_v47  ;;  %v484_v62 = vpop.xlane.xlu2 %483  ;;  %v2773_v36 = vsel %vm2749_vm14, %v3056_v1, %v1178_v58  ;;  %v1328_v49 = vsel %vm2780_vm15, %v2570_v32, %v1324_v18  ;;  %v2790_v31 = vadd.f32 %v3060_v23, %v3059_v50  ;;  %v541_v19 = vld [vmem:[#allocation3 + $0x78] sm:$0xff] }
 0x185   :  { %1384 = vst.msk [vmem:[%s2929_s4 + $0x10] sm:$0xff] %vm39_vm1, %v1367_v57  ;;  %v1083_v21 = vmul.f32 %v1051_v30, %v3054_v38  ;;  %v988_v37 = vld [vmem:[#allocation2 + $0x38] sm:$0xff]  ;;  %v603_v52 = vadd.f32 %v585_v44, %v539_v55  ;;  %v504_v42 = vadd.f32 %v484_v62, %v440_v9  ;;  %v1058_v51 = vadd.f32 14.285714, %v1040_v46 }
 0x186   :  { %v1559_v0 = vpop.eup %1558  ;;  %v1004_v29 = vadd.f32 1e-07, %v988_v37  ;;  %617 = vst.msk [vmem:[#allocation3 + $0x58] sm:$0xff] %vm39_vm1, %v601_v43  ;;  %vm2793_vm2 = vcmp.eq.f32.partialorder %v1329_v27, 8.507059e+37  ;;  %v1332_v48 = vor.u32 1.1754944e-38, %v1331_v45  ;;  %v2798_v32 = vadd.f32 %v2406_v6, %v1338_v13  ;;  %v1071_v57 = vld [vmem:[#allocation3 + $0x50] sm:$0xff] }
 0x187   :  { %v1099_v14 = vsub.f32 %v1067_v7, %v1083_v21  ;;  %v1034_v16 = vmul.f32 0.6931472, %v1559_v0  ;;  %v984_v54 = vld [vmem:[#allocation2 + $0x18] sm:$0xff]  ;;  %619 = vst.msk [vmem:[#allocation3 + $0x68] sm:$0xff] %vm39_vm1, %v603_v52  ;;  %v1561_v33 = vpop.eup %1560  ;;  %vm1341_vm12 = vweird.f32 %v2406_v6  ;;  %v3064_v61 = vsub.f32 1.0, %v2523_v63  ;;  %v3067_v7 = vld [vmem:[#allocation10_spill] sm:$0xff] }
 0x188   :  { %1564 = vlog2.f32 %v1004_v29  ;;  %v1000_v34 = vadd.f32 1e-07, %v984_v54  ;;  %521 = vst.msk [vmem:[#allocation2 + $0x58] sm:$0xff] %vm39_vm1, %v504_v42  ;;  %v1563_v26 = vpop.eup %1562  ;;  %v1090_v44 = vmul.f32 %v1058_v51, %v2440_v53  ;;  %v1333_v18 = vsel %vm2793_vm2, %v1332_v48, %v1328_v49  ;;  %vm2818_vm7 = vmor %vm1340_vm3, %vm1341_vm12 }
 0x189   :  { %v1229_v4 = vmul.f32 %v2662_v8, %v1099_v14  ;;  %v1055_v40 = vadd.f32 14.285714, %v1034_v16  ;;  %v1038_v8 = vmul.f32 0.6931472, %v1561_v33  ;;  %v1042_v9 = vmul.f32 0.6931472, %v1563_v26 }
 0x18a   :  { %1566 = vlog2.f32 %v1000_v34  ;;  %v1308_v60 = vmul.f32 %v2502_v2, %v3064_v61  ;;  %v1344_v46 = vand.u32 2147483647, %v2333_v35  ;;  %v1346_v53 = vand.u32 2147483648, %v2333_v35  ;;  %v3070_v33 = vld [vmem:[#allocation11_spill] sm:$0xff] }
 0x18b   :  { %v1371_v47 = vmul.f32 -1.0, %v1229_v4  ;;  %1568 = vlog2.f32 %v1012_v28  ;;  %v1087_v10 = vmul.f32 %v1055_v40, %v3063_v12  ;;  %v587_v55 = vpop.xlane.xlu1 %586  ;;  %vm1310_vm6 = vweird.f32 %v2394_v20  ;;  %v1068_v4 = vld [vmem:[#allocation3 + $0x38] sm:$0xff] }
 0x18c   :  { %v604_v30 = vadd.f32 %v587_v55, %v540_v25  ;;  %v583_v58 = vpop.xlane.xlu2 %582  ;;  %vm1311_vm0 = vweird.f32 %v2502_v2  ;;  %v1343_v42 = vsel %vm2818_vm7, %v2406_v6, %v2798_v32  ;;  %vm1295_vm5 = vweird.f32 %v3067_v7  ;;  %v1572_v12 = vld [vmem:[#allocation4 + $0x18] sm:$0xff]  ;;  %v3074_v55 = vld [vmem:[#allocation16_spill] sm:$0xff] }
 0x18d   :  { %1388 = vst.msk [vmem:[%s2929_s4 + $0x30] sm:$0xff] %vm39_vm1, %v1371_v47  ;;  %v1103_v11 = vsub.f32 %v1071_v57, %v1087_v10  ;;  %v602_v27 = vadd.f32 %v583_v58, %v538_v24  ;;  %v1057_v35 = vadd.f32 14.285714, %v1038_v8  ;;  %v1059_v29 = vadd.f32 14.285714, %v1042_v9  ;;  %vm2850_vm11 = vmor %vm1310_vm6, %vm1311_vm0  ;;  %v1064_v57 = vld [vmem:[#allocation3 + $0x18] sm:$0xff] }
 0x18e   :  { %v1565_v43 = vpop.eup %1564  ;;  %v1074_v62 = vld [vmem:[#allocation3 + $0x68] sm:$0xff]  ;;  %620 = vst.msk [vmem:[#allocation3 + $0x70] sm:$0xff] %vm39_vm1, %v604_v30  ;;  %vm1296_vm4 = vweird.f32 %v3060_v23  ;;  %vm2835_vm8 = vcmp.eq.f32.partialorder %v1344_v46, 8.507059e+37  ;;  %v1314_v54 = vand.u32 2147483647, %v2394_v20  ;;  %v1316_v1 = vand.u32 2147483648, %v2394_v20 }
 0x18f   :  { %v1289_v38 = vmul.f32 %v2734_v15, %v1103_v11  ;;  %v1028_v21 = vmul.f32 0.6931472, %v1565_v43  ;;  %v1106_v37 = vsub.f32 %v1074_v62, %v1090_v44  ;;  %v992_v52 = vld [vmem:[#allocation2 + $0x58] sm:$0xff]  ;;  %618 = vst.msk [vmem:[#allocation3 + $0x60] sm:$0xff] %vm39_vm1, %v602_v27  ;;  %v1309_v15 = vadd.f32 %v2502_v2, %v1308_v60  ;;  %vm2884_vm10 = vmor %vm1295_vm5, %vm1296_vm4 }
 0x190   :  { %v1567_v0 = vpop.eup %1566  ;;  %v1008_v22 = vadd.f32 1e-07, %v992_v52  ;;  %v1347_v26 = vor.u32 1.1754944e-38, %v1346_v53  ;;  %v1091_v25 = vmul.f32 %v1059_v29, %v3073_v39  ;;  %v1353_v24 = vmul.f32 %v2607_v41, %v1352_v17  ;;  %v1573_v29 = vld [vmem:[#allocation4 + $0x58] sm:$0xff] }
 0x191   :  { %v1569_v45 = vpop.eup %1568  ;;  %v1375_v13 = vmul.f32 -1.0, %v1289_v38  ;;  %v1052_v14 = vadd.f32 14.285714, %v1028_v21  ;;  %v1020_v28 = vmul.f32 0.6931472, %v1567_v0  ;;  %v1334_v16 = vmul.f32 %v1333_v18, %v1106_v37 }
 0x192   :  { %1570 = vlog2.f32 %v1008_v22  ;;  %v1044_v40 = vmul.f32 0.6931472, %v1569_v45  ;;  %v1313_v48 = vsel %vm2850_vm11, %v2502_v2, %v1309_v15  ;;  %v1089_v8 = vmul.f32 %v1057_v35, %v3074_v55 }
 0x193   :  { %1392 = vst.msk [vmem:[%s2929_s4 + $0x50] sm:$0xff] %vm39_vm1, %v1375_v13  ;;  %v1084_v34 = vmul.f32 %v1052_v14, %v3070_v33  ;;  %v1048_v49 = vadd.f32 14.285714, %v1020_v28  ;;  %v1378_v50 = vmul.f32 -1.0, %v1334_v16  ;;  %vm1315_vm13 = vcmp.eq.f32.partialorder %v1314_v54, 8.507059e+37  ;;  %v1072_v28 = vld [vmem:[#allocation3 + $0x58] sm:$0xff] }
 0x194   :  { %v589_v32 = vpop.xlane.xlu2 %588  ;;  %v1317_v58 = vor.u32 1.1754944e-38, %v1316_v1  ;;  %vm1356_vm9 = vweird.f32 %v2607_v41  ;;  %v1348_v61 = vsel %vm2835_vm8, %v1347_v26, %v1343_v42  ;;  %v1060_v44 = vadd.f32 14.285714, %v1044_v40 }
 0x195   :  { %v1100_v47 = vsub.f32 %v1068_v4, %v1084_v34  ;;  %v1080_v20 = vmul.f32 %v1572_v12, %v1048_v49  ;;  %1395 = vst.msk [vmem:[%s2929_s4 + $0x68] sm:$0xff] %vm39_vm1, %v1378_v50  ;;  %v1075_v10 = vld [vmem:[#allocation3 + $0x70] sm:$0xff]  ;;  %v605_v9 = vadd.f32 %v589_v32, %v541_v19  ;;  %v1354_v43 = vadd.f32 %v2607_v41, %v1353_v24 }
 0x196   :  { %v1107_v30 = vsub.f32 %v1075_v10, %v1091_v25  ;;  %v1073_v2 = vld [vmem:[#allocation3 + $0x60] sm:$0xff]  ;;  %v1318_v27 = vsel %vm1315_vm13, %v1317_v58, %v1313_v48  ;;  %v1359_v21 = vand.u32 2147483647, %v2506_v3  ;;  %v1361_v37 = vand.u32 2147483648, %v2506_v3 }
 0x197   :  { %v1244_v5 = vmul.f32 %v2763_v56, %v1100_v47  ;;  %v1096_v17 = vsub.f32 %v1064_v57, %v1080_v20  ;;  %v1105_v60 = vsub.f32 %v1073_v2, %v1089_v8  ;;  %621 = vst.msk [vmem:[#allocation3 + $0x78] sm:$0xff] %vm39_vm1, %v605_v9  ;;  %v1299_v56 = vand.u32 2147483647, %v3067_v7 }
 0x198   :  { %v1571_v11 = vpop.eup %1570  ;;  %v1349_v18 = vmul.f32 %v1348_v61, %v1107_v30  ;;  %vm1355_vm14 = vweird.f32 %v2506_v3  ;;  %v1298_v3 = vsel %vm2884_vm10, %v3060_v23, %v2790_v31  ;;  %v1092_v15 = vmul.f32 %v1060_v44, %v2476_v59 }
 0x199   :  { %v1372_v62 = vmul.f32 -1.0, %v1244_v5  ;;  %v1184_v63 = vmul.f32 %v2773_v36, %v1096_v17  ;;  %v1036_v46 = vmul.f32 0.6931472, %v1571_v11  ;;  %v1319_v53 = vmul.f32 %v1318_v27, %v1105_v60  ;;  %vm2895_vm15 = vmor %vm1355_vm14, %vm1356_vm9 }
 0x19a   :  { %v1379_v38 = vmul.f32 -1.0, %v1349_v18  ;;  %v1358_v45 = vsel %vm2895_vm15, %v2607_v41, %v1354_v43  ;;  %v3079_v13 = vand.u32 2147483648, %v3067_v7  ;;  %v1362_v6 = vor.u32 1.1754944e-38, %v1361_v37 }
 0x19b   :  { %1389 = vst.msk [vmem:[%s2929_s4 + $0x38] sm:$0xff] %vm39_vm1, %v1372_v62  ;;  %v1368_v52 = vmul.f32 -1.0, %v1184_v63  ;;  %v1056_v42 = vadd.f32 14.285714, %v1036_v46  ;;  %v1377_v0 = vmul.f32 -1.0, %v1319_v53  ;;  %vm1300_vm2 = vcmp.eq.f32.partialorder %v1299_v56, 8.507059e+37 }
 0x19c   :  { %1396 = vst.msk [vmem:[%s2929_s4 + $0x70] sm:$0xff] %vm39_vm1, %v1379_v38  ;;  %v1302_v14 = vor.u32 1.1754944e-38, %v3079_v13  ;;  %vm1360_vm3 = vcmp.eq.f32.partialorder %v1359_v21, 8.507059e+37 }
 0x19d   :  { %1385 = vst.msk [vmem:[%s2929_s4 + $0x18] sm:$0xff] %vm39_vm1, %v1368_v52  ;;  %v1088_v22 = vmul.f32 %v1573_v29, %v1056_v42  ;;  %v1363_v31 = vsel %vm1360_vm3, %v1362_v6, %v1358_v45 }
 0x19e   :  { %1394 = vst.msk [vmem:[%s2929_s4 + $0x60] sm:$0xff] %vm39_vm1, %v1377_v0  ;;  %v1076_v16 = vld [vmem:[#allocation3 + $0x78] sm:$0xff]  ;;  %v1303_v59 = vsel %vm1300_vm2, %v1302_v14, %v1298_v3 }
 0x19f   :  { %v1104_v54 = vsub.f32 %v1072_v28, %v1088_v22  ;;  %v1108_v23 = vsub.f32 %v1076_v16, %v1092_v15 }
 0x1a1   :  { %v1304_v1 = vmul.f32 %v1303_v59, %v1104_v54  ;;  %v1364_v19 = vmul.f32 %v1363_v31, %v1108_v23 }
 0x1a3   :  { %v1376_v41 = vmul.f32 -1.0, %v1304_v1  ;;  %v1380_v33 = vmul.f32 -1.0, %v1364_v19 }
 0x1a5   :  { %1393 = vst.msk [vmem:[%s2929_s4 + $0x58] sm:$0xff] %vm39_vm1, %v1376_v41 }
 0x1a6   :  { %1397 = vst.msk [vmem:[%s2929_s4 + $0x78] sm:$0xff] %vm39_vm1, %v1380_v33 }
 0x1a7   :  { %1402 = vsyncpa [#allocation6], 1 }

</bundles_post_ra>
